<compile_context>
chip_gen: v7x
topology: tpu7x:2x2x1
jax: 0.10.0
libtpu: 0.0.40
codegen_flags: <defaults>
</compile_context>

<pallas_src>
import functools

import jax
import jax.numpy as jnp
from jax import lax
from jax.experimental import pallas as pl
from jax.experimental.pallas import tpu as pltpu


# ----------------------------------------------------------------------------
# Pallas kernels
# ----------------------------------------------------------------------------
def _conv_bn_kernel(wT_ref, xT_ref, b_ref, g_ref, be_ref, o_ref, *, eps, half):
    """(OC, K) @ (K, M) conv GEMM + bias + ReLU + train-mode BatchNorm.

    M = batch*OH*OW is the lane-dense last axis.  The batch axis holds the two
    clips concatenated, so BN statistics are computed independently on each
    half of the M axis to match the original per-clip forward passes.
    """
    y = jnp.dot(wT_ref[...], xT_ref[...], preferred_element_type=jnp.float32)
    y = jnp.maximum(y + b_ref[...], 0.0)                      # bias + ReLU

    def bn(v):
        # nn.BatchNorm2d train mode: biased batch statistics per channel (row).
        mean = jnp.mean(v, axis=1, keepdims=True)
        var = jnp.mean(v * v, axis=1, keepdims=True) - mean * mean
        return g_ref[...] * (v - mean) * lax.rsqrt(var + eps) + be_ref[...]

    o_ref[:, :half] = bn(y[:, :half]).astype(o_ref.dtype)
    o_ref[:, half:] = bn(y[:, half:]).astype(o_ref.dtype)


def _mm_bias_kernel(x_ref, w_ref, b_ref, o_ref, acc_ref, *, relu):
    """K-tiled GEMM with f32 accumulator; bias (+ReLU) fused at the last k."""
    @pl.when(pl.program_id(1) == 0)
    def _():
        acc_ref[...] = jnp.zeros_like(acc_ref)

    acc_ref[...] += jnp.dot(x_ref[...], w_ref[...],
                            preferred_element_type=jnp.float32)

    @pl.when(pl.program_id(1) == pl.num_programs(1) - 1)
    def _():
        y = acc_ref[...] + b_ref[...]
        if relu:
            y = jnp.maximum(y, 0.0)
        o_ref[...] = y.astype(o_ref.dtype)


def _sim_count_kernel(f0_ref, f1_ref, f2_ref, f3_ref, sim_ref, cnt_ref, *, eps):
    """All 4 cosine similarities + 4 nonzero counts in one kernel."""
    f0, f1, f2, f3 = f0_ref[...], f1_ref[...], f2_ref[...], f3_ref[...]

    def cs(a, b):
        # Matches the reference cos_sim: eps is added inside each sqrt:
        #   dot / (sqrt(||a||^2+eps) * sqrt(||b||^2+eps))
        dot = jnp.sum(a * b, axis=1, keepdims=True)
        na = jnp.sum(a * a, axis=1, keepdims=True) + eps
        nb = jnp.sum(b * b, axis=1, keepdims=True) + eps
        return dot * lax.rsqrt(na * nb)                       # EUP rsqrt

    sim_ref[...] = jnp.concatenate(
        [cs(f0, f1), cs(f2, f3), cs(f0, f2), cs(f1, f3)], axis=1)

    # nonzero counts in the torch ordering: [image1, flow1, image2, flow2]
    for i, f in enumerate((f0, f1, f2, f3)):
        cnt_ref[i] = jnp.sum((f != 0.0).astype(jnp.int32))


# ----------------------------------------------------------------------------
# Kernel wrappers
# ----------------------------------------------------------------------------
def mm_bias(x, w, b, *, relu):
    """y = relu?(x @ w + b).  x: (M, K) f32, w: (K, N) f32, b: (N,) -> (M, N) f32.

    Operands cast to bf16 (f32 accumulation); M/K tiled so the pattern scales
    to real fc6 sizes (tk-limited weight tiles, pipelined by BlockSpec).
    """
    M, K = x.shape
    K2, N = w.shape
    assert K == K2
    tm = 128 if M >= 128 else M
    tk = 512 if K > 512 else K
    gm = pl.cdiv(M, tm)
    gk = pl.cdiv(K, tk)
    return pl.pallas_call(
        functools.partial(_mm_bias_kernel, relu=relu),
        out_shape=jax.ShapeDtypeStruct((M, N), jnp.float32),
        grid=(gm, gk),
        in_specs=[
            pl.BlockSpec((tm, tk), lambda i, k: (i, k)),
            pl.BlockSpec((tk, N), lambda i, k: (k, 0)),
            pl.BlockSpec((1, N), lambda i, k: (0, 0)),
        ],
        out_specs=pl.BlockSpec((tm, N), lambda i, k: (i, 0)),
        scratch_shapes=[pltpu.VMEM((tm, N), jnp.float32)],
        compiler_params=pltpu.CompilerParams(
            dimension_semantics=("parallel", "arbitrary")),
    )(x.astype(jnp.bfloat16), w.astype(jnp.bfloat16),
      b.reshape(1, N).astype(jnp.float32))


def im2col_T(x, kh, kw, stride, pad):
    """x: (B, C, H, W) -> transposed im2col matrix (C*kh*kw, B*OH*OW)."""
    B, C, H, W = x.shape
    xp = jnp.pad(x, ((0, 0), (0, 0), (pad, pad), (pad, pad)))
    OH = (H + 2 * pad - kh) // stride + 1
    OW = (W + 2 * pad - kw) // stride + 1
    cols = []
    for i in range(kh):
        for j in range(kw):
            cols.append(xp[:, :, i:i + stride * OH:stride,
                           j:j + stride * OW:stride])
    patches = jnp.stack(cols, axis=2)                 # (B, C, kh*kw, OH, OW)
    patches = patches.transpose(1, 2, 0, 3, 4)        # (C, kh*kw, B, OH, OW)
    return patches.reshape(C * kh * kw, B * OH * OW), OH, OW


def conv_block(x, w, b, gamma, beta, *, eps=1e-5):
    """Conv(3x3, s1, p1) + ReLU + BatchNorm(train, per-clip stats) + MaxPool 2x2.

    x is NCHW with the two clips concatenated along the batch axis.
    """
    B2, C, H, W = x.shape
    OC, IC, kh, kw = w.shape
    x_colT, OH, OW = im2col_T(x, kh, kw, stride=1, pad=1)    # (K, B2*OH*OW)
    M = B2 * OH * OW
    # TODO(synk): single-block kernel (whole conv output resident in VMEM); a
    #             full-size CaffeNet conv needs M-tiling and a two-pass BN.
    y = pl.pallas_call(
        functools.partial(_conv_bn_kernel, eps=eps, half=M // 2),
        out_shape=jax.ShapeDtypeStruct((OC, M), jnp.float32),
    )(w.reshape(OC, IC * kh * kw).astype(jnp.bfloat16),
      x_colT.astype(jnp.bfloat16),
      b.reshape(OC, 1).astype(jnp.float32),
      gamma.reshape(OC, 1).astype(jnp.float32),
      beta.reshape(OC, 1).astype(jnp.float32))
    # 2x2 max-pool (cheap layout glue in XLA), then back to NCHW.
    y = y.reshape(OC, B2, OH // 2, 2, OW // 2, 2).max(axis=(3, 5))
    return y.transpose(1, 0, 2, 3)


def sim_and_count(app_feat, mot_feat, *, batch, eps):
    """app_feat/mot_feat: (2B, D) with rows [clip1; clip2]."""
    f0, f2 = app_feat[:batch], app_feat[batch:]    # image1, image2 features
    f1, f3 = mot_feat[:batch], mot_feat[batch:]    # flow1,  flow2  features
    sims, counts = pl.pallas_call(
        functools.partial(_sim_count_kernel, eps=eps),
        out_shape=(jax.ShapeDtypeStruct((batch, 4), jnp.float32),
                   jax.ShapeDtypeStruct((4,), jnp.int32)),
        out_specs=(pl.BlockSpec(memory_space=pltpu.MemorySpace.VMEM),
                   pl.BlockSpec(memory_space=pltpu.MemorySpace.SMEM)),
    )(f0, f1, f2, f3)
    return sims, counts


# ----------------------------------------------------------------------------
# Mini CaffeNet-BN backbone up to layer 'fc6'
# ----------------------------------------------------------------------------
C1, C2, HIDDEN, SPATIAL = 8, 16, 32, 16


def make_net_params(key, in_dim):
    k = jax.random.split(key, 3)
    flat_dim = C2 * (SPATIAL // 4) * (SPATIAL // 4)
    return {
        "conv1_w": 0.1 * jax.random.normal(k[0], (C1, in_dim, 3, 3), jnp.float32),
        "conv1_b": jnp.zeros((C1,), jnp.float32),
        "bn1_g": jnp.ones((C1,), jnp.float32),
        "bn1_b": jnp.zeros((C1,), jnp.float32),
        "conv2_w": 0.1 * jax.random.normal(k[1], (C2, C1, 3, 3), jnp.float32),
        "conv2_b": jnp.zeros((C2,), jnp.float32),
        "bn2_g": jnp.ones((C2,), jnp.float32),
        "bn2_b": jnp.zeros((C2,), jnp.float32),
        # nn.Linear weight is (out, in); stored pre-transposed to (in, out) so
        # the forward path never transposes the (potentially huge) fc6 weight.
        "fc6_w_t": 0.05 * jax.random.normal(k[2], (flat_dim, HIDDEN), jnp.float32),
        "fc6_b": jnp.zeros((HIDDEN,), jnp.float32),
    }


def net_fc6_feature(x, p):
    """features(x) -> flatten -> Dropout(eval=id) -> Linear -> ReLU  (='fc6')."""
    y = conv_block(x, p["conv1_w"], p["conv1_b"], p["bn1_g"], p["bn1_b"])
    y = conv_block(y, p["conv2_w"], p["conv2_b"], p["bn2_g"], p["bn2_b"])
    flat = y.reshape(y.shape[0], -1)
    # TODO(synk): torch module defaults to train() so Dropout would be
    #             stochastic; eval-mode (identity) dropout is used here.
    return mm_bias(flat, p["fc6_w_t"], p["fc6_b"], relu=True)


# ----------------------------------------------------------------------------
# Cross_and_Learn forward (modalities = ['rgb', 'of'], layer = 'fc6')
# ----------------------------------------------------------------------------
def cross_and_learn_forward(image1, flow1, image2, flow2, app_p, mot_p,
                            eps=1e-3):
    B = image1.shape[0]
    # Batch the two clips through each backbone in a single pass.
    app_feat = net_fc6_feature(jnp.concatenate([image1, image2], axis=0), app_p)
    mot_feat = net_fc6_feature(jnp.concatenate([flow1, flow2], axis=0), mot_p)
    sims, nonzeros = sim_and_count(app_feat, mot_feat, batch=B, eps=eps)
    sim_true_1, sim_true_2 = sims[:, 0], sims[:, 1]
    sim_false_1, sim_false_2 = sims[:, 2], sims[:, 3]
    # nonzeros: int32 (4,) device array, order [image1, flow1, image2, flow2]
    # (no blocking host transfer in the forward path).
    return sim_true_1, sim_true_2, sim_false_1, sim_false_2, nonzeros


if __name__ == "__main__":
    B = 2
    NUM_FRAMES = 2                     # scaled-down num_frames (flow C = 2*nf)
    key = jax.random.PRNGKey(0)
    k_img1, k_of1, k_img2, k_of2, k_app, k_mot = jax.random.split(key, 6)

    image1 = jax.random.normal(k_img1, (B, 3, SPATIAL, SPATIAL), jnp.float32)
    flow1 = jax.random.normal(k_of1, (B, NUM_FRAMES * 2, SPATIAL, SPATIAL),
                              jnp.float32)
    image2 = jax.random.normal(k_img2, (B, 3, SPATIAL, SPATIAL), jnp.float32)
    flow2 = jax.random.normal(k_of2, (B, NUM_FRAMES * 2, SPATIAL, SPATIAL),
                              jnp.float32)

    app_params = make_net_params(k_app, 3)
    mot_params = make_net_params(k_mot, NUM_FRAMES * 2)

    fwd = jax.jit(cross_and_learn_forward, static_argnames=("eps",))
    st1, st2, sf1, sf2, nz = fwd(image1, flow1, image2, flow2,
                                 app_params, mot_params, eps=1e-3)
    jax.block_until_ready((st1, st2, sf1, sf2, nz))

    assert st1.shape == (B,) and st2.shape == (B,)
    assert sf1.shape == (B,) and sf2.shape == (B,)
    assert nz.shape == (4,) and nz.dtype == jnp.int32
    print("KERNEL_OK")
</pallas_src>

<mosaic_0001>
module attributes {stable_mosaic.version = 11 : i64} {
  func.func @_conv_bn_kernel(%arg0: memref<8x27xbf16, #tpu.memory_space<vmem>>, %arg1: memref<27x1024xbf16, #tpu.memory_space<vmem>>, %arg2: memref<8x1xf32, #tpu.memory_space<vmem>>, %arg3: memref<8x1xf32, #tpu.memory_space<vmem>>, %arg4: memref<8x1xf32, #tpu.memory_space<vmem>>, %arg5: memref<8x1024xf32, #tpu.memory_space<vmem>>) attributes {dimension_semantics = [], scalar_prefetch = 0 : i64, scratch_operands = 0 : i64, tpu.core_type = #tpu.core_type<tc>} {
    %c0 = arith.constant 0 : index
    %c0_0 = arith.constant 0 : index
    %0 = vector.load %arg0[%c0, %c0_0] : memref<8x27xbf16, #tpu.memory_space<vmem>>, vector<8x27xbf16>
    %c0_1 = arith.constant 0 : index
    %c0_2 = arith.constant 0 : index
    %1 = vector.load %arg1[%c0_1, %c0_2] : memref<27x1024xbf16, #tpu.memory_space<vmem>>, vector<27x1024xbf16>
    %cst = arith.constant dense<0.000000e+00> : vector<8x1024xf32>
    %2 = tpu.matmul %0, %1, %cst {dimension_numbers = #tpu.dot_dimension_numbers<[1], [0], [0], [1], [0, 0, 1, 1], [], []>} : vector<8x27xbf16>, vector<27x1024xbf16>, vector<8x1024xf32> -> vector<8x1024xf32>
    %c0_3 = arith.constant 0 : index
    %c0_4 = arith.constant 0 : index
    %3 = vector.load %arg2[%c0_3, %c0_4] : memref<8x1xf32, #tpu.memory_space<vmem>>, vector<8x1xf32>
    %4 = vector.broadcast %3 : vector<8x1xf32> to vector<8x1024xf32>
    %5 = arith.addf %2, %4 : vector<8x1024xf32>
    %cst_5 = arith.constant 0.000000e+00 : f32
    %6 = vector.broadcast %cst_5 : f32 to vector<8x1024xf32>
    %7 = arith.maximumf %5, %6 : vector<8x1024xf32>
    %8 = vector.extract_strided_slice %7 {offsets = [0, 0], sizes = [8, 512], strides = [1, 1]} : vector<8x1024xf32> to vector<8x512xf32>
    %cst_6 = arith.constant dense<0.000000e+00> : vector<8xf32>
    %9 = vector.multi_reduction <add>, %8, %cst_6 [1] : vector<8x512xf32> to vector<8xf32>
    %10 = vector.shape_cast %9 : vector<8xf32> to vector<8x1xf32>
    %cst_7 = arith.constant 5.120000e+02 : f32
    %11 = vector.broadcast %cst_7 : f32 to vector<8x1xf32>
    %12 = arith.divf %10, %11 : vector<8x1xf32>
    %13 = arith.mulf %8, %8 : vector<8x512xf32>
    %cst_8 = arith.constant dense<0.000000e+00> : vector<8xf32>
    %14 = vector.multi_reduction <add>, %13, %cst_8 [1] : vector<8x512xf32> to vector<8xf32>
    %15 = vector.shape_cast %14 : vector<8xf32> to vector<8x1xf32>
    %cst_9 = arith.constant 5.120000e+02 : f32
    %16 = vector.broadcast %cst_9 : f32 to vector<8x1xf32>
    %17 = arith.divf %15, %16 : vector<8x1xf32>
    %18 = arith.mulf %12, %12 : vector<8x1xf32>
    %19 = arith.subf %17, %18 : vector<8x1xf32>
    %c0_10 = arith.constant 0 : index
    %c0_11 = arith.constant 0 : index
    %20 = vector.load %arg3[%c0_10, %c0_11] : memref<8x1xf32, #tpu.memory_space<vmem>>, vector<8x1xf32>
    %21 = vector.broadcast %12 : vector<8x1xf32> to vector<8x512xf32>
    %22 = arith.subf %8, %21 : vector<8x512xf32>
    %23 = vector.broadcast %20 : vector<8x1xf32> to vector<8x512xf32>
    %24 = arith.mulf %23, %22 : vector<8x512xf32>
    %cst_12 = arith.constant 9.99999974E-6 : f32
    %25 = vector.broadcast %cst_12 : f32 to vector<8x1xf32>
    %26 = arith.addf %19, %25 : vector<8x1xf32>
    %27 = math.rsqrt %26 : vector<8x1xf32>
    %28 = vector.broadcast %27 : vector<8x1xf32> to vector<8x512xf32>
    %29 = arith.mulf %24, %28 : vector<8x512xf32>
    %c0_13 = arith.constant 0 : index
    %c0_14 = arith.constant 0 : index
    %30 = vector.load %arg4[%c0_13, %c0_14] : memref<8x1xf32, #tpu.memory_space<vmem>>, vector<8x1xf32>
    %31 = vector.broadcast %30 : vector<8x1xf32> to vector<8x512xf32>
    %32 = arith.addf %29, %31 : vector<8x512xf32>
    %c0_15 = arith.constant 0 : index
    %c0_16 = arith.constant 0 : index
    %33 = vector.load %arg5[%c0_15, %c0_16] : memref<8x1024xf32, #tpu.memory_space<vmem>>, vector<8x512xf32>
    tpu.vector_store %arg5[%c0_15, %c0_16], %32 {strides = array<i32>} : memref<8x1024xf32, #tpu.memory_space<vmem>>, vector<8x512xf32>,
    %34 = vector.extract_strided_slice %7 {offsets = [0, 512], sizes = [8, 512], strides = [1, 1]} : vector<8x1024xf32> to vector<8x512xf32>
    %cst_17 = arith.constant dense<0.000000e+00> : vector<8xf32>
    %35 = vector.multi_reduction <add>, %34, %cst_17 [1] : vector<8x512xf32> to vector<8xf32>
    %36 = vector.shape_cast %35 : vector<8xf32> to vector<8x1xf32>
    %cst_18 = arith.constant 5.120000e+02 : f32
    %37 = vector.broadcast %cst_18 : f32 to vector<8x1xf32>
    %38 = arith.divf %36, %37 : vector<8x1xf32>
    %39 = arith.mulf %34, %34 : vector<8x512xf32>
    %cst_19 = arith.constant dense<0.000000e+00> : vector<8xf32>
    %40 = vector.multi_reduction <add>, %39, %cst_19 [1] : vector<8x512xf32> to vector<8xf32>
    %41 = vector.shape_cast %40 : vector<8xf32> to vector<8x1xf32>
    %cst_20 = arith.constant 5.120000e+02 : f32
    %42 = vector.broadcast %cst_20 : f32 to vector<8x1xf32>
    %43 = arith.divf %41, %42 : vector<8x1xf32>
    %44 = arith.mulf %38, %38 : vector<8x1xf32>
    %45 = arith.subf %43, %44 : vector<8x1xf32>
    %c0_21 = arith.constant 0 : index
    %c0_22 = arith.constant 0 : index
    %46 = vector.load %arg3[%c0_21, %c0_22] : memref<8x1xf32, #tpu.memory_space<vmem>>, vector<8x1xf32>
    %47 = vector.broadcast %38 : vector<8x1xf32> to vector<8x512xf32>
    %48 = arith.subf %34, %47 : vector<8x512xf32>
    %49 = vector.broadcast %46 : vector<8x1xf32> to vector<8x512xf32>
    %50 = arith.mulf %49, %48 : vector<8x512xf32>
    %cst_23 = arith.constant 9.99999974E-6 : f32
    %51 = vector.broadcast %cst_23 : f32 to vector<8x1xf32>
    %52 = arith.addf %45, %51 : vector<8x1xf32>
    %53 = math.rsqrt %52 : vector<8x1xf32>
    %54 = vector.broadcast %53 : vector<8x1xf32> to vector<8x512xf32>
    %55 = arith.mulf %50, %54 : vector<8x512xf32>
    %c0_24 = arith.constant 0 : index
    %c0_25 = arith.constant 0 : index
    %56 = vector.load %arg4[%c0_24, %c0_25] : memref<8x1xf32, #tpu.memory_space<vmem>>, vector<8x1xf32>
    %57 = vector.broadcast %56 : vector<8x1xf32> to vector<8x512xf32>
    %58 = arith.addf %55, %57 : vector<8x512xf32>
    %c0_26 = arith.constant 0 : index
    %c512 = arith.constant 512 : index
    %59 = vector.load %arg5[%c0_26, %c512] : memref<8x1024xf32, #tpu.memory_space<vmem>>, vector<8x512xf32>
    tpu.vector_store %arg5[%c0_26, %c512], %58 {strides = array<i32>} : memref<8x1024xf32, #tpu.memory_space<vmem>>, vector<8x512xf32>,
    return
  }
}

module attributes {stable_mosaic.version = 11 : i64} {
  func.func @_conv_bn_kernel(%arg0: memref<16x72xbf16, #tpu.memory_space<vmem>>, %arg1: memref<72x256xbf16, #tpu.memory_space<vmem>>, %arg2: memref<16x1xf32, #tpu.memory_space<vmem>>, %arg3: memref<16x1xf32, #tpu.memory_space<vmem>>, %arg4: memref<16x1xf32, #tpu.memory_space<vmem>>, %arg5: memref<16x256xf32, #tpu.memory_space<vmem>>) attributes {dimension_semantics = [], scalar_prefetch = 0 : i64, scratch_operands = 0 : i64, tpu.core_type = #tpu.core_type<tc>} {
    %c0 = arith.constant 0 : index
    %c0_0 = arith.constant 0 : index
    %0 = vector.load %arg0[%c0, %c0_0] : memref<16x72xbf16, #tpu.memory_space<vmem>>, vector<16x72xbf16>
    %c0_1 = arith.constant 0 : index
    %c0_2 = arith.constant 0 : index
    %1 = vector.load %arg1[%c0_1, %c0_2] : memref<72x256xbf16, #tpu.memory_space<vmem>>, vector<72x256xbf16>
    %cst = arith.constant dense<0.000000e+00> : vector<16x256xf32>
    %2 = tpu.matmul %0, %1, %cst {dimension_numbers = #tpu.dot_dimension_numbers<[1], [0], [0], [1], [0, 0, 1, 1], [], []>} : vector<16x72xbf16>, vector<72x256xbf16>, vector<16x256xf32> -> vector<16x256xf32>
    %c0_3 = arith.constant 0 : index
    %c0_4 = arith.constant 0 : index
    %3 = vector.load %arg2[%c0_3, %c0_4] : memref<16x1xf32, #tpu.memory_space<vmem>>, vector<16x1xf32>
    %4 = vector.broadcast %3 : vector<16x1xf32> to vector<16x256xf32>
    %5 = arith.addf %2, %4 : vector<16x256xf32>
    %cst_5 = arith.constant 0.000000e+00 : f32
    %6 = vector.broadcast %cst_5 : f32 to vector<16x256xf32>
    %7 = arith.maximumf %5, %6 : vector<16x256xf32>
    %8 = vector.extract_strided_slice %7 {offsets = [0, 0], sizes = [16, 128], strides = [1, 1]} : vector<16x256xf32> to vector<16x128xf32>
    %cst_6 = arith.constant dense<0.000000e+00> : vector<16xf32>
    %9 = vector.multi_reduction <add>, %8, %cst_6 [1] : vector<16x128xf32> to vector<16xf32>
    %10 = vector.shape_cast %9 : vector<16xf32> to vector<16x1xf32>
    %cst_7 = arith.constant 1.280000e+02 : f32
    %11 = vector.broadcast %cst_7 : f32 to vector<16x1xf32>
    %12 = arith.divf %10, %11 : vector<16x1xf32>
    %13 = arith.mulf %8, %8 : vector<16x128xf32>
    %cst_8 = arith.constant dense<0.000000e+00> : vector<16xf32>
    %14 = vector.multi_reduction <add>, %13, %cst_8 [1] : vector<16x128xf32> to vector<16xf32>
    %15 = vector.shape_cast %14 : vector<16xf32> to vector<16x1xf32>
    %cst_9 = arith.constant 1.280000e+02 : f32
    %16 = vector.broadcast %cst_9 : f32 to vector<16x1xf32>
    %17 = arith.divf %15, %16 : vector<16x1xf32>
    %18 = arith.mulf %12, %12 : vector<16x1xf32>
    %19 = arith.subf %17, %18 : vector<16x1xf32>
    %c0_10 = arith.constant 0 : index
    %c0_11 = arith.constant 0 : index
    %20 = vector.load %arg3[%c0_10, %c0_11] : memref<16x1xf32, #tpu.memory_space<vmem>>, vector<16x1xf32>
    %21 = vector.broadcast %12 : vector<16x1xf32> to vector<16x128xf32>
    %22 = arith.subf %8, %21 : vector<16x128xf32>
    %23 = vector.broadcast %20 : vector<16x1xf32> to vector<16x128xf32>
    %24 = arith.mulf %23, %22 : vector<16x128xf32>
    %cst_12 = arith.constant 9.99999974E-6 : f32
    %25 = vector.broadcast %cst_12 : f32 to vector<16x1xf32>
    %26 = arith.addf %19, %25 : vector<16x1xf32>
    %27 = math.rsqrt %26 : vector<16x1xf32>
    %28 = vector.broadcast %27 : vector<16x1xf32> to vector<16x128xf32>
    %29 = arith.mulf %24, %28 : vector<16x128xf32>
    %c0_13 = arith.constant 0 : index
    %c0_14 = arith.constant 0 : index
    %30 = vector.load %arg4[%c0_13, %c0_14] : memref<16x1xf32, #tpu.memory_space<vmem>>, vector<16x1xf32>
    %31 = vector.broadcast %30 : vector<16x1xf32> to vector<16x128xf32>
    %32 = arith.addf %29, %31 : vector<16x128xf32>
    %c0_15 = arith.constant 0 : index
    %c0_16 = arith.constant 0 : index
    %33 = vector.load %arg5[%c0_15, %c0_16] : memref<16x256xf32, #tpu.memory_space<vmem>>, vector<16x128xf32>
    tpu.vector_store %arg5[%c0_15, %c0_16], %32 {strides = array<i32>} : memref<16x256xf32, #tpu.memory_space<vmem>>, vector<16x128xf32>,
    %34 = vector.extract_strided_slice %7 {offsets = [0, 128], sizes = [16, 128], strides = [1, 1]} : vector<16x256xf32> to vector<16x128xf32>
    %cst_17 = arith.constant dense<0.000000e+00> : vector<16xf32>
    %35 = vector.multi_reduction <add>, %34, %cst_17 [1] : vector<16x128xf32> to vector<16xf32>
    %36 = vector.shape_cast %35 : vector<16xf32> to vector<16x1xf32>
    %cst_18 = arith.constant 1.280000e+02 : f32
    %37 = vector.broadcast %cst_18 : f32 to vector<16x1xf32>
    %38 = arith.divf %36, %37 : vector<16x1xf32>
    %39 = arith.mulf %34, %34 : vector<16x128xf32>
    %cst_19 = arith.constant dense<0.000000e+00> : vector<16xf32>
    %40 = vector.multi_reduction <add>, %39, %cst_19 [1] : vector<16x128xf32> to vector<16xf32>
    %41 = vector.shape_cast %40 : vector<16xf32> to vector<16x1xf32>
    %cst_20 = arith.constant 1.280000e+02 : f32
    %42 = vector.broadcast %cst_20 : f32 to vector<16x1xf32>
    %43 = arith.divf %41, %42 : vector<16x1xf32>
    %44 = arith.mulf %38, %38 : vector<16x1xf32>
    %45 = arith.subf %43, %44 : vector<16x1xf32>
    %c0_21 = arith.constant 0 : index
    %c0_22 = arith.constant 0 : index
    %46 = vector.load %arg3[%c0_21, %c0_22] : memref<16x1xf32, #tpu.memory_space<vmem>>, vector<16x1xf32>
    %47 = vector.broadcast %38 : vector<16x1xf32> to vector<16x128xf32>
    %48 = arith.subf %34, %47 : vector<16x128xf32>
    %49 = vector.broadcast %46 : vector<16x1xf32> to vector<16x128xf32>
    %50 = arith.mulf %49, %48 : vector<16x128xf32>
    %cst_23 = arith.constant 9.99999974E-6 : f32
    %51 = vector.broadcast %cst_23 : f32 to vector<16x1xf32>
    %52 = arith.addf %45, %51 : vector<16x1xf32>
    %53 = math.rsqrt %52 : vector<16x1xf32>
    %54 = vector.broadcast %53 : vector<16x1xf32> to vector<16x128xf32>
    %55 = arith.mulf %50, %54 : vector<16x128xf32>
    %c0_24 = arith.constant 0 : index
    %c0_25 = arith.constant 0 : index
    %56 = vector.load %arg4[%c0_24, %c0_25] : memref<16x1xf32, #tpu.memory_space<vmem>>, vector<16x1xf32>
    %57 = vector.broadcast %56 : vector<16x1xf32> to vector<16x128xf32>
    %58 = arith.addf %55, %57 : vector<16x128xf32>
    %c0_26 = arith.constant 0 : index
    %c128 = arith.constant 128 : index
    %59 = vector.load %arg5[%c0_26, %c128] : memref<16x256xf32, #tpu.memory_space<vmem>>, vector<16x128xf32>
    tpu.vector_store %arg5[%c0_26, %c128], %58 {strides = array<i32>} : memref<16x256xf32, #tpu.memory_space<vmem>>, vector<16x128xf32>,
    return
  }
}

module attributes {stable_mosaic.version = 11 : i64} {
  func.func @_mm_bias_kernel(%arg0: i32, %arg1: i32, %arg2: memref<4x256xbf16, #tpu.memory_space<vmem>>, %arg3: memref<256x32xbf16, #tpu.memory_space<vmem>>, %arg4: memref<1x32xf32, #tpu.memory_space<vmem>>, %arg5: memref<4x32xf32, #tpu.memory_space<vmem>>, %arg6: memref<4x32xf32, #tpu.memory_space<vmem>>) attributes {dimension_semantics = [#tpu.dimension_semantics<parallel>, #tpu.dimension_semantics<arbitrary>], iteration_bounds = array<i64: 1, 1>, scalar_prefetch = 0 : i64, scratch_operands = 1 : i64, tpu.core_type = #tpu.core_type<tc>, window_params = [{transform_indices = @transform_0, window_bounds = array<i64: 4, 256>}, {transform_indices = @transform_1, window_bounds = array<i64: 256, 32>}, {pipeline_mode = #tpu.pipeline_mode<synchronous>, transform_indices = @transform_2, window_bounds = array<i64: 1, 32>}, {transform_indices = @transform_3, window_bounds = array<i64: 4, 32>}]} {
    %c0_i32 = arith.constant 0 : i32
    %0 = arith.cmpi eq, %arg1, %c0_i32 : i32
    %1 = arith.extui %0 : i1 to i32
    %c0_i32_0 = arith.constant 0 : i32
    %2 = arith.cmpi ne, %1, %c0_i32_0 : i32
    scf.if %2 {
      %cst_10 = arith.constant 0.000000e+00 : f32
      %12 = vector.broadcast %cst_10 : f32 to vector<4x32xf32>
      %c0_11 = arith.constant 0 : index
      %c0_12 = arith.constant 0 : index
      %13 = vector.load %arg6[%c0_11, %c0_12] : memref<4x32xf32, #tpu.memory_space<vmem>>, vector<4x32xf32>
      tpu.vector_store %arg6[%c0_11, %c0_12], %12 {strides = array<i32>} : memref<4x32xf32, #tpu.memory_space<vmem>>, vector<4x32xf32>,
    } else {
    }
    %c0 = arith.constant 0 : index
    %c0_1 = arith.constant 0 : index
    %3 = vector.load %arg6[%c0, %c0_1] : memref<4x32xf32, #tpu.memory_space<vmem>>, vector<4x32xf32>
    %c0_2 = arith.constant 0 : index
    %c0_3 = arith.constant 0 : index
    %4 = vector.load %arg2[%c0_2, %c0_3] : memref<4x256xbf16, #tpu.memory_space<vmem>>, vector<4x256xbf16>
    %c0_4 = arith.constant 0 : index
    %c0_5 = arith.constant 0 : index
    %5 = vector.load %arg3[%c0_4, %c0_5] : memref<256x32xbf16, #tpu.memory_space<vmem>>, vector<256x32xbf16>
    %cst = arith.constant dense<0.000000e+00> : vector<4x32xf32>
    %6 = tpu.matmul %4, %5, %cst {dimension_numbers = #tpu.dot_dimension_numbers<[1], [0], [0], [1], [0, 0, 1, 1], [], []>} : vector<4x256xbf16>, vector<256x32xbf16>, vector<4x32xf32> -> vector<4x32xf32>
    %7 = arith.addf %3, %6 : vector<4x32xf32>
    %c0_6 = arith.constant 0 : index
    %c0_7 = arith.constant 0 : index
    %8 = vector.load %arg6[%c0_6, %c0_7] : memref<4x32xf32, #tpu.memory_space<vmem>>, vector<4x32xf32>
    tpu.vector_store %arg6[%c0_6, %c0_7], %7 {strides = array<i32>} : memref<4x32xf32, #tpu.memory_space<vmem>>, vector<4x32xf32>,
    %c0_i32_8 = arith.constant 0 : i32
    %9 = arith.cmpi eq, %arg1, %c0_i32_8 : i32
    %10 = arith.extui %9 : i1 to i32
    %c0_i32_9 = arith.constant 0 : i32
    %11 = arith.cmpi ne, %10, %c0_i32_9 : i32
    scf.if %11 {
      %c0_10 = arith.constant 0 : index
      %c0_11 = arith.constant 0 : index
      %12 = vector.load %arg6[%c0_10, %c0_11] : memref<4x32xf32, #tpu.memory_space<vmem>>, vector<4x32xf32>
      %c0_12 = arith.constant 0 : index
      %c0_13 = arith.constant 0 : index
      %13 = vector.load %arg4[%c0_12, %c0_13] : memref<1x32xf32, #tpu.memory_space<vmem>>, vector<1x32xf32>
      %14 = vector.broadcast %13 : vector<1x32xf32> to vector<4x32xf32>
      %15 = arith.addf %12, %14 : vector<4x32xf32>
      %cst_14 = arith.constant 0.000000e+00 : f32
      %16 = vector.broadcast %cst_14 : f32 to vector<4x32xf32>
      %17 = arith.maximumf %15, %16 : vector<4x32xf32>
      %c0_15 = arith.constant 0 : index
      %c0_16 = arith.constant 0 : index
      %18 = vector.load %arg5[%c0_15, %c0_16] : memref<4x32xf32, #tpu.memory_space<vmem>>, vector<4x32xf32>
      tpu.vector_store %arg5[%c0_15, %c0_16], %17 {strides = array<i32>} : memref<4x32xf32, #tpu.memory_space<vmem>>, vector<4x32xf32>,
    } else {
    }
    return
  }
  func.func @transform_0(%arg0: i32, %arg1: i32) -> (i32, i32) {
    %c0_i32 = arith.constant 0 : i32
    return %arg0, %arg1 : i32, i32
  }
  func.func @transform_1(%arg0: i32, %arg1: i32) -> (i32, i32) {
    %c0_i32 = arith.constant 0 : i32
    %c0_i32_0 = arith.constant 0 : i32
    return %arg1, %c0_i32 : i32, i32
  }
  func.func @transform_2(%arg0: i32, %arg1: i32) -> (i32, i32) {
    %c0_i32 = arith.constant 0 : i32
    %c0_i32_0 = arith.constant 0 : i32
    %c0_i32_1 = arith.constant 0 : i32
    return %c0_i32, %c0_i32_0 : i32, i32
  }
  func.func @transform_3(%arg0: i32, %arg1: i32) -> (i32, i32) {
    %c0_i32 = arith.constant 0 : i32
    %c0_i32_0 = arith.constant 0 : i32
    return %arg0, %c0_i32 : i32, i32
  }
}

module attributes {stable_mosaic.version = 11 : i64} {
  func.func @_conv_bn_kernel(%arg0: memref<8x36xbf16, #tpu.memory_space<vmem>>, %arg1: memref<36x1024xbf16, #tpu.memory_space<vmem>>, %arg2: memref<8x1xf32, #tpu.memory_space<vmem>>, %arg3: memref<8x1xf32, #tpu.memory_space<vmem>>, %arg4: memref<8x1xf32, #tpu.memory_space<vmem>>, %arg5: memref<8x1024xf32, #tpu.memory_space<vmem>>) attributes {dimension_semantics = [], scalar_prefetch = 0 : i64, scratch_operands = 0 : i64, tpu.core_type = #tpu.core_type<tc>} {
    %c0 = arith.constant 0 : index
    %c0_0 = arith.constant 0 : index
    %0 = vector.load %arg0[%c0, %c0_0] : memref<8x36xbf16, #tpu.memory_space<vmem>>, vector<8x36xbf16>
    %c0_1 = arith.constant 0 : index
    %c0_2 = arith.constant 0 : index
    %1 = vector.load %arg1[%c0_1, %c0_2] : memref<36x1024xbf16, #tpu.memory_space<vmem>>, vector<36x1024xbf16>
    %cst = arith.constant dense<0.000000e+00> : vector<8x1024xf32>
    %2 = tpu.matmul %0, %1, %cst {dimension_numbers = #tpu.dot_dimension_numbers<[1], [0], [0], [1], [0, 0, 1, 1], [], []>} : vector<8x36xbf16>, vector<36x1024xbf16>, vector<8x1024xf32> -> vector<8x1024xf32>
    %c0_3 = arith.constant 0 : index
    %c0_4 = arith.constant 0 : index
    %3 = vector.load %arg2[%c0_3, %c0_4] : memref<8x1xf32, #tpu.memory_space<vmem>>, vector<8x1xf32>
    %4 = vector.broadcast %3 : vector<8x1xf32> to vector<8x1024xf32>
    %5 = arith.addf %2, %4 : vector<8x1024xf32>
    %cst_5 = arith.constant 0.000000e+00 : f32
    %6 = vector.broadcast %cst_5 : f32 to vector<8x1024xf32>
    %7 = arith.maximumf %5, %6 : vector<8x1024xf32>
    %8 = vector.extract_strided_slice %7 {offsets = [0, 0], sizes = [8, 512], strides = [1, 1]} : vector<8x1024xf32> to vector<8x512xf32>
    %cst_6 = arith.constant dense<0.000000e+00> : vector<8xf32>
    %9 = vector.multi_reduction <add>, %8, %cst_6 [1] : vector<8x512xf32> to vector<8xf32>
    %10 = vector.shape_cast %9 : vector<8xf32> to vector<8x1xf32>
    %cst_7 = arith.constant 5.120000e+02 : f32
    %11 = vector.broadcast %cst_7 : f32 to vector<8x1xf32>
    %12 = arith.divf %10, %11 : vector<8x1xf32>
    %13 = arith.mulf %8, %8 : vector<8x512xf32>
    %cst_8 = arith.constant dense<0.000000e+00> : vector<8xf32>
    %14 = vector.multi_reduction <add>, %13, %cst_8 [1] : vector<8x512xf32> to vector<8xf32>
    %15 = vector.shape_cast %14 : vector<8xf32> to vector<8x1xf32>
    %cst_9 = arith.constant 5.120000e+02 : f32
    %16 = vector.broadcast %cst_9 : f32 to vector<8x1xf32>
    %17 = arith.divf %15, %16 : vector<8x1xf32>
    %18 = arith.mulf %12, %12 : vector<8x1xf32>
    %19 = arith.subf %17, %18 : vector<8x1xf32>
    %c0_10 = arith.constant 0 : index
    %c0_11 = arith.constant 0 : index
    %20 = vector.load %arg3[%c0_10, %c0_11] : memref<8x1xf32, #tpu.memory_space<vmem>>, vector<8x1xf32>
    %21 = vector.broadcast %12 : vector<8x1xf32> to vector<8x512xf32>
    %22 = arith.subf %8, %21 : vector<8x512xf32>
    %23 = vector.broadcast %20 : vector<8x1xf32> to vector<8x512xf32>
    %24 = arith.mulf %23, %22 : vector<8x512xf32>
    %cst_12 = arith.constant 9.99999974E-6 : f32
    %25 = vector.broadcast %cst_12 : f32 to vector<8x1xf32>
    %26 = arith.addf %19, %25 : vector<8x1xf32>
    %27 = math.rsqrt %26 : vector<8x1xf32>
    %28 = vector.broadcast %27 : vector<8x1xf32> to vector<8x512xf32>
    %29 = arith.mulf %24, %28 : vector<8x512xf32>
    %c0_13 = arith.constant 0 : index
    %c0_14 = arith.constant 0 : index
    %30 = vector.load %arg4[%c0_13, %c0_14] : memref<8x1xf32, #tpu.memory_space<vmem>>, vector<8x1xf32>
    %31 = vector.broadcast %30 : vector<8x1xf32> to vector<8x512xf32>
    %32 = arith.addf %29, %31 : vector<8x512xf32>
    %c0_15 = arith.constant 0 : index
    %c0_16 = arith.constant 0 : index
    %33 = vector.load %arg5[%c0_15, %c0_16] : memref<8x1024xf32, #tpu.memory_space<vmem>>, vector<8x512xf32>
    tpu.vector_store %arg5[%c0_15, %c0_16], %32 {strides = array<i32>} : memref<8x1024xf32, #tpu.memory_space<vmem>>, vector<8x512xf32>,
    %34 = vector.extract_strided_slice %7 {offsets = [0, 512], sizes = [8, 512], strides = [1, 1]} : vector<8x1024xf32> to vector<8x512xf32>
    %cst_17 = arith.constant dense<0.000000e+00> : vector<8xf32>
    %35 = vector.multi_reduction <add>, %34, %cst_17 [1] : vector<8x512xf32> to vector<8xf32>
    %36 = vector.shape_cast %35 : vector<8xf32> to vector<8x1xf32>
    %cst_18 = arith.constant 5.120000e+02 : f32
    %37 = vector.broadcast %cst_18 : f32 to vector<8x1xf32>
    %38 = arith.divf %36, %37 : vector<8x1xf32>
    %39 = arith.mulf %34, %34 : vector<8x512xf32>
    %cst_19 = arith.constant dense<0.000000e+00> : vector<8xf32>
    %40 = vector.multi_reduction <add>, %39, %cst_19 [1] : vector<8x512xf32> to vector<8xf32>
    %41 = vector.shape_cast %40 : vector<8xf32> to vector<8x1xf32>
    %cst_20 = arith.constant 5.120000e+02 : f32
    %42 = vector.broadcast %cst_20 : f32 to vector<8x1xf32>
    %43 = arith.divf %41, %42 : vector<8x1xf32>
    %44 = arith.mulf %38, %38 : vector<8x1xf32>
    %45 = arith.subf %43, %44 : vector<8x1xf32>
    %c0_21 = arith.constant 0 : index
    %c0_22 = arith.constant 0 : index
    %46 = vector.load %arg3[%c0_21, %c0_22] : memref<8x1xf32, #tpu.memory_space<vmem>>, vector<8x1xf32>
    %47 = vector.broadcast %38 : vector<8x1xf32> to vector<8x512xf32>
    %48 = arith.subf %34, %47 : vector<8x512xf32>
    %49 = vector.broadcast %46 : vector<8x1xf32> to vector<8x512xf32>
    %50 = arith.mulf %49, %48 : vector<8x512xf32>
    %cst_23 = arith.constant 9.99999974E-6 : f32
    %51 = vector.broadcast %cst_23 : f32 to vector<8x1xf32>
    %52 = arith.addf %45, %51 : vector<8x1xf32>
    %53 = math.rsqrt %52 : vector<8x1xf32>
    %54 = vector.broadcast %53 : vector<8x1xf32> to vector<8x512xf32>
    %55 = arith.mulf %50, %54 : vector<8x512xf32>
    %c0_24 = arith.constant 0 : index
    %c0_25 = arith.constant 0 : index
    %56 = vector.load %arg4[%c0_24, %c0_25] : memref<8x1xf32, #tpu.memory_space<vmem>>, vector<8x1xf32>
    %57 = vector.broadcast %56 : vector<8x1xf32> to vector<8x512xf32>
    %58 = arith.addf %55, %57 : vector<8x512xf32>
    %c0_26 = arith.constant 0 : index
    %c512 = arith.constant 512 : index
    %59 = vector.load %arg5[%c0_26, %c512] : memref<8x1024xf32, #tpu.memory_space<vmem>>, vector<8x512xf32>
    tpu.vector_store %arg5[%c0_26, %c512], %58 {strides = array<i32>} : memref<8x1024xf32, #tpu.memory_space<vmem>>, vector<8x512xf32>,
    return
  }
}

module attributes {stable_mosaic.version = 11 : i64} {
  func.func @_sim_count_kernel(%arg0: memref<2x32xf32, #tpu.memory_space<vmem>>, %arg1: memref<2x32xf32, #tpu.memory_space<vmem>>, %arg2: memref<2x32xf32, #tpu.memory_space<vmem>>, %arg3: memref<2x32xf32, #tpu.memory_space<vmem>>, %arg4: memref<2x4xf32, #tpu.memory_space<vmem>>, %arg5: memref<4xi32, #tpu.memory_space<smem>>) attributes {dimension_semantics = [], scalar_prefetch = 0 : i64, scratch_operands = 0 : i64, tpu.core_type = #tpu.core_type<tc>} {
    %c0 = arith.constant 0 : index
    %c0_0 = arith.constant 0 : index
    %0 = vector.load %arg0[%c0, %c0_0] : memref<2x32xf32, #tpu.memory_space<vmem>>, vector<2x32xf32>
    %c0_1 = arith.constant 0 : index
    %c0_2 = arith.constant 0 : index
    %1 = vector.load %arg1[%c0_1, %c0_2] : memref<2x32xf32, #tpu.memory_space<vmem>>, vector<2x32xf32>
    %c0_3 = arith.constant 0 : index
    %c0_4 = arith.constant 0 : index
    %2 = vector.load %arg2[%c0_3, %c0_4] : memref<2x32xf32, #tpu.memory_space<vmem>>, vector<2x32xf32>
    %c0_5 = arith.constant 0 : index
    %c0_6 = arith.constant 0 : index
    %3 = vector.load %arg3[%c0_5, %c0_6] : memref<2x32xf32, #tpu.memory_space<vmem>>, vector<2x32xf32>
    %4 = arith.mulf %0, %1 : vector<2x32xf32>
    %cst = arith.constant dense<0.000000e+00> : vector<2xf32>
    %5 = vector.multi_reduction <add>, %4, %cst [1] : vector<2x32xf32> to vector<2xf32>
    %6 = vector.shape_cast %5 : vector<2xf32> to vector<2x1xf32>
    %7 = arith.mulf %0, %0 : vector<2x32xf32>
    %cst_7 = arith.constant dense<0.000000e+00> : vector<2xf32>
    %8 = vector.multi_reduction <add>, %7, %cst_7 [1] : vector<2x32xf32> to vector<2xf32>
    %9 = vector.shape_cast %8 : vector<2xf32> to vector<2x1xf32>
    %cst_8 = arith.constant 1.000000e-03 : f32
    %10 = vector.broadcast %cst_8 : f32 to vector<2x1xf32>
    %11 = arith.addf %9, %10 : vector<2x1xf32>
    %12 = arith.mulf %1, %1 : vector<2x32xf32>
    %cst_9 = arith.constant dense<0.000000e+00> : vector<2xf32>
    %13 = vector.multi_reduction <add>, %12, %cst_9 [1] : vector<2x32xf32> to vector<2xf32>
    %14 = vector.shape_cast %13 : vector<2xf32> to vector<2x1xf32>
    %cst_10 = arith.constant 1.000000e-03 : f32
    %15 = vector.broadcast %cst_10 : f32 to vector<2x1xf32>
    %16 = arith.addf %14, %15 : vector<2x1xf32>
    %17 = arith.mulf %11, %16 : vector<2x1xf32>
    %18 = math.rsqrt %17 : vector<2x1xf32>
    %19 = arith.mulf %6, %18 : vector<2x1xf32>
    %20 = arith.mulf %2, %3 : vector<2x32xf32>
    %cst_11 = arith.constant dense<0.000000e+00> : vector<2xf32>
    %21 = vector.multi_reduction <add>, %20, %cst_11 [1] : vector<2x32xf32> to vector<2xf32>
    %22 = vector.shape_cast %21 : vector<2xf32> to vector<2x1xf32>
    %23 = arith.mulf %2, %2 : vector<2x32xf32>
    %cst_12 = arith.constant dense<0.000000e+00> : vector<2xf32>
    %24 = vector.multi_reduction <add>, %23, %cst_12 [1] : vector<2x32xf32> to vector<2xf32>
    %25 = vector.shape_cast %24 : vector<2xf32> to vector<2x1xf32>
    %cst_13 = arith.constant 1.000000e-03 : f32
    %26 = vector.broadcast %cst_13 : f32 to vector<2x1xf32>
    %27 = arith.addf %25, %26 : vector<2x1xf32>
    %28 = arith.mulf %3, %3 : vector<2x32xf32>
    %cst_14 = arith.constant dense<0.000000e+00> : vector<2xf32>
    %29 = vector.multi_reduction <add>, %28, %cst_14 [1] : vector<2x32xf32> to vector<2xf32>
    %30 = vector.shape_cast %29 : vector<2xf32> to vector<2x1xf32>
    %cst_15 = arith.constant 1.000000e-03 : f32
    %31 = vector.broadcast %cst_15 : f32 to vector<2x1xf32>
    %32 = arith.addf %30, %31 : vector<2x1xf32>
    %33 = arith.mulf %27, %32 : vector<2x1xf32>
    %34 = math.rsqrt %33 : vector<2x1xf32>
    %35 = arith.mulf %22, %34 : vector<2x1xf32>
    %36 = arith.mulf %0, %2 : vector<2x32xf32>
    %cst_16 = arith.constant dense<0.000000e+00> : vector<2xf32>
    %37 = vector.multi_reduction <add>, %36, %cst_16 [1] : vector<2x32xf32> to vector<2xf32>
    %38 = vector.shape_cast %37 : vector<2xf32> to vector<2x1xf32>
    %39 = arith.mulf %0, %0 : vector<2x32xf32>
    %cst_17 = arith.constant dense<0.000000e+00> : vector<2xf32>
    %40 = vector.multi_reduction <add>, %39, %cst_17 [1] : vector<2x32xf32> to vector<2xf32>
    %41 = vector.shape_cast %40 : vector<2xf32> to vector<2x1xf32>
    %cst_18 = arith.constant 1.000000e-03 : f32
    %42 = vector.broadcast %cst_18 : f32 to vector<2x1xf32>
    %43 = arith.addf %41, %42 : vector<2x1xf32>
    %44 = arith.mulf %2, %2 : vector<2x32xf32>
    %cst_19 = arith.constant dense<0.000000e+00> : vector<2xf32>
    %45 = vector.multi_reduction <add>, %44, %cst_19 [1] : vector<2x32xf32> to vector<2xf32>
    %46 = vector.shape_cast %45 : vector<2xf32> to vector<2x1xf32>
    %cst_20 = arith.constant 1.000000e-03 : f32
    %47 = vector.broadcast %cst_20 : f32 to vector<2x1xf32>
    %48 = arith.addf %46, %47 : vector<2x1xf32>
    %49 = arith.mulf %43, %48 : vector<2x1xf32>
    %50 = math.rsqrt %49 : vector<2x1xf32>
    %51 = arith.mulf %38, %50 : vector<2x1xf32>
    %52 = arith.mulf %1, %3 : vector<2x32xf32>
    %cst_21 = arith.constant dense<0.000000e+00> : vector<2xf32>
    %53 = vector.multi_reduction <add>, %52, %cst_21 [1] : vector<2x32xf32> to vector<2xf32>
    %54 = vector.shape_cast %53 : vector<2xf32> to vector<2x1xf32>
    %55 = arith.mulf %1, %1 : vector<2x32xf32>
    %cst_22 = arith.constant dense<0.000000e+00> : vector<2xf32>
    %56 = vector.multi_reduction <add>, %55, %cst_22 [1] : vector<2x32xf32> to vector<2xf32>
    %57 = vector.shape_cast %56 : vector<2xf32> to vector<2x1xf32>
    %cst_23 = arith.constant 1.000000e-03 : f32
    %58 = vector.broadcast %cst_23 : f32 to vector<2x1xf32>
    %59 = arith.addf %57, %58 : vector<2x1xf32>
    %60 = arith.mulf %3, %3 : vector<2x32xf32>
    %cst_24 = arith.constant dense<0.000000e+00> : vector<2xf32>
    %61 = vector.multi_reduction <add>, %60, %cst_24 [1] : vector<2x32xf32> to vector<2xf32>
    %62 = vector.shape_cast %61 : vector<2xf32> to vector<2x1xf32>
    %cst_25 = arith.constant 1.000000e-03 : f32
    %63 = vector.broadcast %cst_25 : f32 to vector<2x1xf32>
    %64 = arith.addf %62, %63 : vector<2x1xf32>
    %65 = arith.mulf %59, %64 : vector<2x1xf32>
    %66 = math.rsqrt %65 : vector<2x1xf32>
    %67 = arith.mulf %54, %66 : vector<2x1xf32>
    %68 = tpu.concatenate %19, %35, %51, %67 in 1 : vector<2x1xf32>, vector<2x1xf32>, vector<2x1xf32>, vector<2x1xf32> -> vector<2x4xf32>
    %c0_26 = arith.constant 0 : index
    %c0_27 = arith.constant 0 : index
    %69 = vector.load %arg4[%c0_26, %c0_27] : memref<2x4xf32, #tpu.memory_space<vmem>>, vector<2x4xf32>
    tpu.vector_store %arg4[%c0_26, %c0_27], %68 {strides = array<i32>} : memref<2x4xf32, #tpu.memory_space<vmem>>, vector<2x4xf32>,
    %cst_28 = arith.constant 0.000000e+00 : f32
    %70 = vector.broadcast %cst_28 : f32 to vector<2x32xf32>
    %71 = arith.cmpf one, %0, %70 : vector<2x32xf32>
    %72 = arith.extui %71 : vector<2x32xi1> to vector<2x32xi32>
    %73 = vector.shape_cast %72 : vector<2x32xi32> to vector<1x2x32xi32>
    %cst_29 = arith.constant dense<0> : vector<1xi32>
    %74 = vector.multi_reduction <add>, %73, %cst_29 [1, 2] : vector<1x2x32xi32> to vector<1xi32>
    %75 = vector.shape_cast %74 : vector<1xi32> to vector<1x1x1xi32>
    %76 = vector.extract %75[0, 0, 0] : i32 from vector<1x1x1xi32>
    %c0_30 = arith.constant 0 : index
    %77 = memref.load %arg5[%c0_30] : memref<4xi32, #tpu.memory_space<smem>>
    memref.store %76, %arg5[%c0_30] : memref<4xi32, #tpu.memory_space<smem>>
    %cst_31 = arith.constant 0.000000e+00 : f32
    %78 = vector.broadcast %cst_31 : f32 to vector<2x32xf32>
    %79 = arith.cmpf one, %1, %78 : vector<2x32xf32>
    %80 = arith.extui %79 : vector<2x32xi1> to vector<2x32xi32>
    %81 = vector.shape_cast %80 : vector<2x32xi32> to vector<1x2x32xi32>
    %cst_32 = arith.constant dense<0> : vector<1xi32>
    %82 = vector.multi_reduction <add>, %81, %cst_32 [1, 2] : vector<1x2x32xi32> to vector<1xi32>
    %83 = vector.shape_cast %82 : vector<1xi32> to vector<1x1x1xi32>
    %84 = vector.extract %83[0, 0, 0] : i32 from vector<1x1x1xi32>
    %c1 = arith.constant 1 : index
    %85 = memref.load %arg5[%c1] : memref<4xi32, #tpu.memory_space<smem>>
    memref.store %84, %arg5[%c1] : memref<4xi32, #tpu.memory_space<smem>>
    %cst_33 = arith.constant 0.000000e+00 : f32
    %86 = vector.broadcast %cst_33 : f32 to vector<2x32xf32>
    %87 = arith.cmpf one, %2, %86 : vector<2x32xf32>
    %88 = arith.extui %87 : vector<2x32xi1> to vector<2x32xi32>
    %89 = vector.shape_cast %88 : vector<2x32xi32> to vector<1x2x32xi32>
    %cst_34 = arith.constant dense<0> : vector<1xi32>
    %90 = vector.multi_reduction <add>, %89, %cst_34 [1, 2] : vector<1x2x32xi32> to vector<1xi32>
    %91 = vector.shape_cast %90 : vector<1xi32> to vector<1x1x1xi32>
    %92 = vector.extract %91[0, 0, 0] : i32 from vector<1x1x1xi32>
    %c2 = arith.constant 2 : index
    %93 = memref.load %arg5[%c2] : memref<4xi32, #tpu.memory_space<smem>>
    memref.store %92, %arg5[%c2] : memref<4xi32, #tpu.memory_space<smem>>
    %cst_35 = arith.constant 0.000000e+00 : f32
    %94 = vector.broadcast %cst_35 : f32 to vector<2x32xf32>
    %95 = arith.cmpf one, %3, %94 : vector<2x32xf32>
    %96 = arith.extui %95 : vector<2x32xi1> to vector<2x32xi32>
    %97 = vector.shape_cast %96 : vector<2x32xi32> to vector<1x2x32xi32>
    %cst_36 = arith.constant dense<0> : vector<1xi32>
    %98 = vector.multi_reduction <add>, %97, %cst_36 [1, 2] : vector<1x2x32xi32> to vector<1xi32>
    %99 = vector.shape_cast %98 : vector<1xi32> to vector<1x1x1xi32>
    %100 = vector.extract %99[0, 0, 0] : i32 from vector<1x1x1xi32>
    %c3 = arith.constant 3 : index
    %101 = memref.load %arg5[%c3] : memref<4xi32, #tpu.memory_space<smem>>
    memref.store %100, %arg5[%c3] : memref<4xi32, #tpu.memory_space<smem>>
    return
  }
}

</mosaic_0001>

<bundles_post_ra>
// kernel: cross_and_learn_forward.7
= control target key start
LH: loop header
LB: loop body
LE: loop exit
PB: predicated region body
PF: predicated region fallthrough
CT: control target
= control target key end

     0   :  { %vm120_vm0 = vcmask 1044480   ;;  %vm121_vm1 = vcmask 1045504   ;;  %v457_v3 = vmov 65535   ;;  %v458_v5 = vmov 0   ;;  %s631_s1 = inlined_call_operand.vmem [shape: bf16[27,1024], index: 1, kind: input, shape index: {}]   ;;  %s632_s2 = inlined_call_operand.vmem [shape: f32[8,1], index: 2, kind: input, shape index: {}]   ;;  %s633_s3 = inlined_call_operand.vmem [shape: f32[8,1], index: 3, kind: input, shape index: {}]   ;;  %s634_s0 = inlined_call_operand.vmem [shape: bf16[8,27], index: 0, kind: input, shape index: {}]   ;;  %s635_s4 = inlined_call_operand.vmem [shape: f32[8,1], index: 4, kind: input, shape index: {}]   ;;  %s636_s5 = inlined_call_operand.vmem [shape: f32[8,1024], index: 5, kind: output, shape index: {}]  }
   0x1   :  { %v22_v0 = vld [vmem:[%s631_s1] sm:$0xff]  ;;  %v23_v2 = vld [vmem:[%s631_s1 + $0x8] sm:$0xff]  ;;  %v122_v4 = vsel %vm120_vm0, 4294967295, %v457_v3  ;;  %180 = vmatprep.mubr.bf16.mxu0 %v458_v5  ;;  %221 = vmatprep.mubr.bf16.mxu1 %v458_v5  ;;  %v24_v20 = vld [vmem:[%s631_s1 + $0x10] sm:$0xff]  ;;  %vm116_vm2 = vcmask 220160  }
   0x2   :  { %v26_v1 = vld [vmem:[%s631_s1 + $0x20] sm:$0xff]  ;;  %v27_v7 = vld [vmem:[%s631_s1 + $0x28] sm:$0xff]  ;;  %v123_v11 = vsel %vm121_vm1, %v122_v4, 0  ;;  %451 = vset.pattern.permute.xlu0 %v458_v5  ;;  %452 = vset.pattern.permute.xlu1 %v458_v5  ;;  %v28_v21 = vld [vmem:[%s631_s1 + $0x30] sm:$0xff] }
   0x3   :  { %v430_v6 = vcombine.high %v22_v0, %v26_v1  ;;  %v429_v8 = vcombine.low %v22_v0, %v26_v1  ;;  %v30_v9 = vld [vmem:[%s631_s1 + $0x40] sm:$0xff]  ;;  %v432_v12 = vcombine.high %v23_v2, %v27_v7  ;;  %v431_v13 = vcombine.low %v23_v2, %v27_v7  ;;  %v31_v15 = vld [vmem:[%s631_s1 + $0x48] sm:$0xff]  ;;  %v25_v22 = vld [vmem:[%s631_s1 + $0x18] sm:$0xff] }
   0x4   :  { %v34_v10 = vld [vmem:[%s631_s1 + $0x60] sm:$0x33]  ;;  %v35_v16 = vld [vmem:[%s631_s1 + $0x68] sm:$0x33]  ;;  %v29_v25 = vld [vmem:[%s631_s1 + $0x38] sm:$0xff]  ;;  %v434_v30 = vcombine.high %v24_v20, %v28_v21  ;;  %v433_v39 = vcombine.low %v24_v20, %v28_v21 }
   0x5   :  { %v438_v14 = vcombine.high %v30_v9, %v34_v10  ;;  %v437_v17 = vcombine.low %v30_v9, %v34_v10  ;;  %148 = vmatprep.subr.bf16.mxu0 %v430_v6  ;;  %v440_v18 = vcombine.high %v31_v15, %v35_v16  ;;  %v439_v19 = vcombine.low %v31_v15, %v35_v16  ;;  %v32_v26 = vld [vmem:[%s631_s1 + $0x50] sm:$0xff]  ;;  %v33_v31 = vld [vmem:[%s631_s1 + $0x58] sm:$0xff]  ;;  %v38_v33 = vld [vmem:[%s632_s2] sm:$0xff] }
   0x6   :  { %189 = vmatprep.subr.bf16.mxu1 %v432_v12  ;;  %149 = vmatpush1.bf16.msra.mxu0 %v429_v8  ;;  %v36_v27 = vld [vmem:[%s631_s1 + $0x70] sm:$0x33]  ;;  %v37_v32 = vld [vmem:[%s631_s1 + $0x78] sm:$0x33]  ;;  %v436_v34 = vcombine.high %v25_v22, %v29_v25  ;;  %v339_v36 = vld [vmem:[%s633_s3] sm:$0xff]  ;;  %v435_v41 = vcombine.low %v25_v22, %v29_v25 }
   0x7   :  { %v128_v23 = vand.u32 %v438_v14, %v123_v11  ;;  %v125_v24 = vand.u32 %v437_v17, %v123_v11  ;;  %190 = vmatpush1.bf16.msra.mxu1 %v431_v13  ;;  %v134_v28 = vand.u32 %v440_v18, %v123_v11  ;;  %v131_v29 = vand.u32 %v439_v19, %v123_v11  ;;  %v21_v38 = vld [vmem:[%s634_s0] sm:$0xf] }
   0x8   :  { %v442_v35 = vcombine.high %v32_v26, %v36_v27  ;;  %v444_v37 = vcombine.high %v33_v31, %v37_v32  ;;  %41 = vperm.xlu0 %451, %v38_v33   ;;  %v441_v40 = vcombine.low %v32_v26, %v36_v27  ;;  %346 = vperm.xlu1 %452, %v339_v36  }
   0x9   :  { %150 = vmatprep.subr.bf16.mxu0 %v128_v23  ;;  %191 = vmatprep.subr.bf16.mxu1 %v134_v28  ;;  %v443_v43 = vcombine.low %v33_v31, %v37_v32 }
   0xa   :  { %151 = vmatpush1.bf16.msra.mxu0 %v125_v24  ;;  %v140_v42 = vand.u32 %v442_v35, %v123_v11  ;;  %v146_v44 = vand.u32 %v444_v37, %v123_v11  ;;  %v137_v45 = vand.u32 %v441_v40, %v123_v11 }
   0xb   :  { %192 = vmatpush1.bf16.msra.mxu1 %v131_v29  ;;  %230 = vmatprep.subr.bf16.mxu0 %v434_v30  ;;  %v143_v46 = vand.u32 %v443_v43, %v123_v11 }
   0xc   :  { %271 = vmatprep.subr.bf16.mxu1 %v436_v34  ;;  %398 = vperm.xlu1 %452, %v339_v36   ;;  %v411_v36 = vld [vmem:[%s635_s4] sm:$0xff] }
   0xd   :  { %445 = vmatmul.mubr.msk.bf16.vlgmr.msra.gmra.mrb[0].mxu0 %vm116_vm2, %v21_v38 }
   0xe   :  { %446 = vmatmul.mubr.msk.bf16.vlgmr.msra.gmra.mrb[0].mxu1 %vm116_vm2, %v21_v38  ;;  %231 = vmatpush1.bf16.msra.mxu0 %v433_v39 }
   0xf   :  { %272 = vmatpush1.bf16.msra.mxu1 %v435_v41  ;;  %232 = vmatprep.subr.bf16.mxu0 %v140_v42 }
  0x10   :  { %273 = vmatprep.subr.bf16.mxu1 %v146_v44  ;;  %262 = vmatprep.mubr.bf16.mxu0 %v458_v5 }
  0x11   :  { %303 = vmatprep.mubr.bf16.mxu1 %v458_v5 }
  0x12   :  { %233 = vmatpush1.bf16.msra.mxu0 %v137_v45 }
  0x13   :  { %274 = vmatpush1.bf16.msra.mxu1 %v143_v46 }
  0x15   :  { %447 = vmatmul.mubr.msk.bf16.vlgmr.msra.gmra.mrb[4].mxu0 %vm116_vm2, %v21_v38 }
  0x16   :  { %448 = vmatmul.mubr.msk.bf16.vlgmr.msra.gmra.mrb[4].mxu1 %vm116_vm2, %v21_v38 }
  0x87   :  { %v42_v47 = vpop.permute.xlu0 %41  ;;  %v347_v37 = vpop.permute.xlu1 %346 }
  0x8b   :  { %v399_v38 = vpop.permute.xlu1 %398 }
  0xe0   :  { %v182_v48 = vpop.f32.mrb[0].mxu0 }
  0xe1   :  { %v184_v49 = vpop.f32.mrb[1].mxu0  ;;  %v223_v50 = vpop.f32.mrb[0].mxu1  ;;  %v183_v51 = vadd.f32 %v182_v48, %v42_v47 }
  0xe2   :  { %v185_v52 = vadd.f32 %v184_v49, %v42_v47  ;;  %v224_v53 = vadd.f32 %v223_v50, %v42_v47  ;;  %v186_v54 = vpop.f32.mrb[2].mxu0  ;;  %v225_v55 = vpop.f32.mrb[1].mxu1 }
  0xe3   :  { %v226_v56 = vadd.f32 %v225_v55, %v42_v47  ;;  %v187_v57 = vpop.f32.mrb[3].mxu0  ;;  %v227_v58 = vpop.f32.mrb[2].mxu1  ;;  %v556_v59 = vmax.f32 %v183_v51, 0.0 }
  0xe4   :  { %v558_v60 = vmax.f32 %v185_v52, 0.0  ;;  %v560_v61 = vmax.f32 %v224_v53, 0.0  ;;  %v228_v62 = vpop.f32.mrb[3].mxu1 }
  0xe5   :  { %v562_v63 = vmax.f32 %v226_v56, 0.0  ;;  %v327_v0 = vmul.f32 %v556_v59, %v556_v59 }
  0xe6   :  { %v328_v1 = vmul.f32 %v558_v60, %v558_v60  ;;  %v320_v2 = vadd.f32 %v558_v60, %v556_v59  ;;  %v329_v3 = vmul.f32 %v560_v61, %v560_v61 }
  0xe7   :  { %v330_v10 = vmul.f32 %v562_v63, %v562_v63 }
  0xe8   :  { %v264_v4 = vpop.f32.mrb[4].mxu0  ;;  %v321_v5 = vadd.f32 %v320_v2, %v560_v61  ;;  %v331_v6 = vadd.f32 %v328_v1, %v327_v0 }
  0xe9   :  { %v265_v7 = vadd.f32 %v264_v4, %v42_v47  ;;  %v305_v8 = vpop.f32.mrb[4].mxu1  ;;  %v266_v9 = vpop.f32.mrb[5].mxu0 }
  0xea   :  { %v306_v11 = vadd.f32 %v305_v8, %v42_v47  ;;  %v267_v12 = vadd.f32 %v266_v9, %v42_v47  ;;  %v307_v13 = vpop.f32.mrb[5].mxu1  ;;  %v268_v14 = vpop.f32.mrb[6].mxu0  ;;  %v322_v15 = vadd.f32 %v321_v5, %v562_v63  ;;  %v332_v16 = vadd.f32 %v331_v6, %v329_v3 }
  0xeb   :  { %v576_v17 = vmax.f32 %v265_v7, 0.0  ;;  %v269_v18 = vpop.f32.mrb[7].mxu0  ;;  %v309_v19 = vpop.f32.mrb[6].mxu1  ;;  %v308_v22 = vadd.f32 %v307_v13, %v42_v47 }
  0xec   :  { %v578_v20 = vmax.f32 %v306_v11, 0.0  ;;  %v580_v21 = vmax.f32 %v267_v12, 0.0  ;;  %v310_v23 = vpop.f32.mrb[7].mxu1  ;;  %323 = vadd.xlane.f32.xlu0 %v322_v15  ;;  %v333_v24 = vadd.f32 %v332_v16, %v330_v10 }
  0xed   :  { %v379_v25 = vmul.f32 %v576_v17, %v576_v17  ;;  %v588_v28 = vmax.f32 %v308_v22, 0.0 }
  0xee   :  { %v380_v26 = vmul.f32 %v580_v21, %v580_v21  ;;  %334 = vadd.xlane.f32.xlu1 %v333_v24  ;;  %v373_v27 = vadd.f32 %v580_v21, %v576_v17  ;;  %v381_v30 = vmul.f32 %v578_v20, %v578_v20 }
  0xef   :  { %v382_v34 = vmul.f32 %v588_v28, %v588_v28 }
  0xf0   :  { %v374_v29 = vadd.f32 %v373_v27, %v578_v20  ;;  %v383_v31 = vadd.f32 %v380_v26, %v379_v25 }
  0xf2   :  { %v375_v32 = vadd.f32 %v374_v29, %v588_v28  ;;  %v384_v33 = vadd.f32 %v383_v31, %v381_v30 }
  0xf4   :  { %376 = vadd.xlane.f32.xlu1 %v375_v32  ;;  %v385_v35 = vadd.f32 %v384_v33, %v382_v34 }
  0xf8   :  { %386 = vadd.xlane.f32.xlu1 %v385_v35 }
 0x102   :  { %414 = vperm.xlu0 %451, %v411_v36  }
 0x109   :  { %362 = vperm.xlu1 %452, %v411_v36  }
 0x179   :  { %v324_v39 = vpop.xlane.xlu0 %323 }
 0x17a   :  { %v326_v40 = vmul.f32 0.001953125, %v324_v39 }
 0x17b   :  { %v335_v41 = vpop.xlane.xlu1 %334 }
 0x17c   :  { %v336_v42 = vmul.f32 0.001953125, %v335_v41  ;;  %v337_v43 = vmul.f32 %v326_v40, %v326_v40  ;;  %v340_v49 = vsub.f32 %v556_v59, %v326_v40  ;;  %v341_v52 = vsub.f32 %v558_v60, %v326_v40 }
 0x17d   :  { %v342_v53 = vsub.f32 %v560_v61, %v326_v40  ;;  %v343_v54 = vsub.f32 %v562_v63, %v326_v40 }
 0x17e   :  { %v338_v44 = vsub.f32 %v336_v42, %v337_v43  ;;  %v349_v57 = vmul.f32 %v347_v37, %v340_v49  ;;  %v350_v58 = vmul.f32 %v347_v37, %v341_v52 }
 0x17f   :  { %v351_v62 = vmul.f32 %v347_v37, %v342_v53  ;;  %v352_v1 = vmul.f32 %v347_v37, %v343_v54 }
 0x180   :  { %v353_v45 = vadd.f32 1e-05, %v338_v44 }
 0x181   :  { %v377_v46 = vpop.xlane.xlu1 %376 }
 0x182   :  { %453 = vrsqrt.f32 %v353_v45  ;;  %v378_v47 = vmul.f32 0.001953125, %v377_v46 }
 0x184   :  { %v389_v50 = vmul.f32 %v378_v47, %v378_v47  ;;  %v392_v61 = vsub.f32 %v576_v17, %v378_v47  ;;  %v393_v63 = vsub.f32 %v580_v21, %v378_v47  ;;  %v394_v9 = vsub.f32 %v578_v20, %v378_v47  ;;  %v415_v17 = vpop.permute.xlu0 %414 }
 0x185   :  { %v387_v48 = vpop.xlane.xlu1 %386  ;;  %v395_v10 = vsub.f32 %v588_v28, %v378_v47 }
 0x186   :  { %v388_v51 = vmul.f32 0.001953125, %v387_v48  ;;  %v401_v11 = vmul.f32 %v399_v38, %v392_v61  ;;  %v402_v12 = vmul.f32 %v399_v38, %v393_v63  ;;  %v403_v13 = vmul.f32 %v399_v38, %v394_v9 }
 0x187   :  { %v404_v14 = vmul.f32 %v399_v38, %v395_v10 }
 0x188   :  { %v390_v55 = vsub.f32 %v388_v51, %v389_v50 }
 0x189   :  { %v363_v59 = vpop.permute.xlu1 %362 }
 0x18a   :  { %v405_v56 = vadd.f32 1e-05, %v390_v55 }
 0x18c   :  { %v454_v0 = vpop.eup %453  ;;  %455 = vrsqrt.f32 %v405_v56 }
 0x18d   :  { %v355_v2 = vmul.f32 %v454_v0, %v349_v57  ;;  %v356_v3 = vmul.f32 %v454_v0, %v350_v58  ;;  %v357_v4 = vmul.f32 %v454_v0, %v351_v62  ;;  %v358_v5 = vmul.f32 %v454_v0, %v352_v1 }
 0x18f   :  { %v365_v6 = vadd.f32 %v363_v59, %v355_v2  ;;  %v366_v7 = vadd.f32 %v363_v59, %v356_v3  ;;  %v367_v60 = vadd.f32 %v363_v59, %v357_v4  ;;  %v368_v8 = vadd.f32 %v363_v59, %v358_v5 }
 0x191   :  { %369 = vst [vmem:[%s636_s5] sm:$0xff] %v365_v6  ;;  %370 = vst [vmem:[%s636_s5 + $0x8] sm:$0xff] %v366_v7 }
 0x192   :  { %371 = vst [vmem:[%s636_s5 + $0x10] sm:$0xff] %v367_v60  ;;  %372 = vst [vmem:[%s636_s5 + $0x18] sm:$0xff] %v368_v8 }
 0x196   :  { %v456_v15 = vpop.eup %455 }
 0x197   :  { %v407_v16 = vmul.f32 %v456_v15, %v401_v11  ;;  %v408_v18 = vmul.f32 %v456_v15, %v402_v12  ;;  %v409_v19 = vmul.f32 %v456_v15, %v403_v13  ;;  %v410_v22 = vmul.f32 %v456_v15, %v404_v14 }
 0x199   :  { %v417_v23 = vadd.f32 %v415_v17, %v407_v16  ;;  %v418_v21 = vadd.f32 %v415_v17, %v408_v18  ;;  %v419_v24 = vadd.f32 %v415_v17, %v409_v19  ;;  %v420_v20 = vadd.f32 %v415_v17, %v410_v22 }
 0x19b   :  { %421 = vst [vmem:[%s636_s5 + $0x20] sm:$0xff] %v417_v23  ;;  %422 = vst [vmem:[%s636_s5 + $0x28] sm:$0xff] %v418_v21 }
 0x19c   :  { %423 = vst [vmem:[%s636_s5 + $0x30] sm:$0xff] %v419_v24  ;;  %424 = vst [vmem:[%s636_s5 + $0x38] sm:$0xff] %v420_v20 }

// kernel: cross_and_learn_forward.8
= control target key start
LH: loop header
LB: loop body
LE: loop exit
PB: predicated region body
PF: predicated region fallthrough
CT: control target
= control target key end

     0   :  { %v308_v1 = vmov 0   ;;  %vm98_vm0 = vcmask 1043456   ;;  %vm94_vm1 = vcmask 588800   ;;  %s417_s1 = inlined_call_operand.vmem [shape: bf16[72,256], index: 1, kind: input, shape index: {}]   ;;  %s418_s2 = inlined_call_operand.vmem [shape: f32[16,1], index: 2, kind: input, shape index: {}]   ;;  %s419_s0 = inlined_call_operand.vmem [shape: bf16[16,72], index: 0, kind: input, shape index: {}]   ;;  %s420_s3 = inlined_call_operand.vmem [shape: f32[16,1], index: 3, kind: input, shape index: {}]   ;;  %s421_s4 = inlined_call_operand.vmem [shape: f32[16,1], index: 4, kind: input, shape index: {}]   ;;  %s422_s5 = inlined_call_operand.vmem [shape: f32[16,256], index: 5, kind: output, shape index: {}]  }
   0x1   :  { %v285_v0 = vld [vmem:[%s417_s1 + $0x4] ss:$8 sps:$4 sm:$0xff]   ;;  %137 = vmatprep.mubr.bf16.mxu0 %v308_v1  ;;  %283 = vset.pattern.permute.xlu0 %v308_v1  ;;  %v287_v2 = vld [vmem:[%s417_s1] ss:$8 sps:$4 sm:$0xff]   ;;  %v288_v3 = vld [vmem:[%s417_s1 + $0x14] ss:$8 sps:$4 sm:$0xff]  }
   0x2   :  { %284 = vset.pattern.permute.xlu1 %v308_v1  ;;  %105 = vmatprep.subr.bf16.mxu0 %v285_v0  ;;  %v290_v4 = vld [vmem:[%s417_s1 + $0x10] ss:$8 sps:$4 sm:$0xff]   ;;  %v291_v5 = vld [vmem:[%s417_s1 + $0x24] ss:$8 sps:$4 sm:$0xff]   ;;  %v293_v7 = vld [vmem:[%s417_s1 + $0x20] ss:$8 sps:$4 sm:$0xff]  }
   0x3   :  { %106 = vmatpush1.bf16.msra.mxu0 %v287_v2  ;;  %v32_v6 = vld [vmem:[%s418_s2] sm:$0xff]  ;;  %v294_v9 = vld [vmem:[%s417_s1 + $0x34] ss:$8 sps:$4 sm:$0xff]   ;;  %v33_v10 = vld [vmem:[%s418_s2 + $0x8] sm:$0xff] }
   0x4   :  { %107 = vmatprep.subr.bf16.mxu0 %v288_v3  ;;  %36 = vperm.xlu0 %283, %v32_v6   ;;  %v171_v8 = vld [vmem:[%s420_s3] sm:$0xff]  ;;  %v296_v12 = vld [vmem:[%s417_s1 + $0x30] ss:$8 sps:$4 sm:$0xff]   ;;  %v172_v15 = vld [vmem:[%s420_s3 + $0x8] sm:$0xff] }
   0x5   :  { %177 = vperm.xlu1 %284, %v171_v8   ;;  %v31_v11 = vld [vmem:[%s417_s1 + $0x40] sm:$0xff]  ;;  %v194_v19 = vld [vmem:[%s421_s4 + $0x8] sm:$0xff] }
   0x6   :  { %v279_v13 = vcombine.high %v31_v11, %v31_v11  ;;  %v278_v14 = vcombine.low %v31_v11, %v31_v11  ;;  %v193_v17 = vld [vmem:[%s421_s4] sm:$0xff] }
   0x7   :  { %108 = vmatpush1.bf16.msra.mxu0 %v290_v4  ;;  %v299_v18 = vld [vmem:[%s419_s0] sm:$0xff]  }
   0x8   :  { %109 = vmatprep.subr.bf16.mxu0 %v291_v5  ;;  %41 = vperm.xlu0 %283, %v33_v10   ;;  %v100_v16 = vsel %vm98_vm0, %v278_v14, 0 }
   0x9   :  { %233 = vperm.xlu1 %284, %v171_v8  }
   0xb   :  { %110 = vmatpush1.bf16.msra.mxu0 %v293_v7 }
   0xc   :  { %111 = vmatprep.subr.bf16.mxu0 %v294_v9  ;;  %182 = vperm.xlu0 %283, %v172_v15  }
   0xd   :  { %238 = vperm.xlu1 %284, %v172_v15  }
   0xf   :  { %112 = vmatpush1.bf16.msra.mxu0 %v296_v12 }
  0x10   :  { %280 = vmatprep.subr.msk.bf16.mxu0 %vm98_vm0, %v279_v13 }
  0x11   :  { %197 = vperm.xlu1 %284, %v193_v17  }
  0x13   :  { %114 = vmatpush1.bf16.msra.mxu0 %v100_v16 }
  0x15   :  { %202 = vperm.xlu1 %284, %v194_v19  }
  0x16   :  { %281 = vmatmul.mubr.msk.bf16.vlgmr.msra.gmra.mrb[0].mxu0 %vm94_vm1, %v299_v18 }
  0x83   :  { %v37_v20 = vpop.permute.xlu0 %36 }
  0x84   :  { %v178_v38 = vpop.permute.xlu1 %177 }
  0x87   :  { %v42_v24 = vpop.permute.xlu0 %41 }
  0x88   :  { %v234_v39 = vpop.permute.xlu1 %233 }
  0x8b   :  { %v183_v46 = vpop.permute.xlu0 %182 }
  0x8c   :  { %v239_v40 = vpop.permute.xlu1 %238 }
  0x90   :  { %v198_v41 = vpop.permute.xlu1 %197 }
  0x94   :  { %v203_v42 = vpop.permute.xlu1 %202 }
  0xe9   :  { %v139_v21 = vpop.f32.mrb[0].mxu0 }
  0xea   :  { %v140_v22 = vadd.f32 %v139_v21, %v37_v20  ;;  %v141_v23 = vpop.f32.mrb[1].mxu0 }
  0xeb   :  { %v142_v25 = vadd.f32 %v141_v23, %v37_v20  ;;  %v143_v26 = vpop.f32.mrb[2].mxu0 }
  0xec   :  { %v148_v27 = vmax.f32 %v140_v22, 0.0  ;;  %v144_v28 = vadd.f32 %v143_v26, %v42_v24  ;;  %v145_v29 = vpop.f32.mrb[3].mxu0 }
  0xed   :  { %v387_v30 = vmax.f32 %v142_v25, 0.0  ;;  %v146_v32 = vadd.f32 %v145_v29, %v42_v24 }
  0xee   :  { %152 = vadd.xlane.f32.xlu1 %v148_v27  ;;  %v390_v31 = vmax.f32 %v144_v28, 0.0  ;;  %v159_v33 = vmul.f32 %v148_v27, %v148_v27 }
  0xef   :  { %209 = vadd.xlane.f32.xlu0 %v387_v30  ;;  %v393_v34 = vmax.f32 %v146_v32, 0.0  ;;  %v215_v35 = vmul.f32 %v387_v30, %v387_v30 }
  0xf0   :  { %v160_v36 = vmul.f32 %v390_v31, %v390_v31 }
  0xf1   :  { %v216_v37 = vmul.f32 %v393_v34, %v393_v34 }
  0xf2   :  { %154 = vadd.xlane.f32.xlu1 %v390_v31 }
  0xf6   :  { %161 = vadd.xlane.f32.xlu1 %v159_v33 }
  0xfa   :  { %211 = vadd.xlane.f32.xlu1 %v393_v34 }
  0xfe   :  { %217 = vadd.xlane.f32.xlu1 %v215_v35 }
 0x102   :  { %163 = vadd.xlane.f32.xlu1 %v160_v36 }
 0x105   :  { %253 = vperm.xlu0 %283, %v193_v17  }
 0x106   :  { %219 = vadd.xlane.f32.xlu1 %v216_v37 }
 0x117   :  { %258 = vperm.xlu1 %284, %v194_v19  }
 0x17b   :  { %v153_v43 = vpop.xlane.xlu1 %152 }
 0x17c   :  { %v157_v45 = vmul.f32 0.0078125, %v153_v43  ;;  %v210_v50 = vpop.xlane.xlu0 %209 }
 0x17d   :  { %v213_v53 = vmul.f32 0.0078125, %v210_v50 }
 0x17e   :  { %v167_v48 = vmul.f32 %v157_v45, %v157_v45  ;;  %v173_v60 = vsub.f32 %v148_v27, %v157_v45 }
 0x17f   :  { %v155_v44 = vpop.xlane.xlu1 %154  ;;  %v223_v56 = vmul.f32 %v213_v53, %v213_v53  ;;  %v229_v11 = vsub.f32 %v387_v30, %v213_v53 }
 0x180   :  { %v158_v57 = vmul.f32 0.0078125, %v155_v44  ;;  %v185_v3 = vmul.f32 %v178_v38, %v173_v60 }
 0x181   :  { %v241_v14 = vmul.f32 %v234_v39, %v229_v11 }
 0x182   :  { %v168_v62 = vmul.f32 %v158_v57, %v158_v57  ;;  %v174_v15 = vsub.f32 %v390_v31, %v158_v57 }
 0x183   :  { %v162_v47 = vpop.xlane.xlu1 %161 }
 0x184   :  { %v165_v49 = vmul.f32 0.0078125, %v162_v47  ;;  %v254_v18 = vpop.permute.xlu0 %253  ;;  %v186_v19 = vmul.f32 %v183_v46, %v174_v15 }
 0x186   :  { %v169_v51 = vsub.f32 %v165_v49, %v167_v48 }
 0x187   :  { %v212_v52 = vpop.xlane.xlu1 %211 }
 0x188   :  { %v187_v54 = vadd.f32 1e-05, %v169_v51  ;;  %v214_v63 = vmul.f32 0.0078125, %v212_v52 }
 0x18a   :  { %300 = vrsqrt.f32 %v187_v54  ;;  %v224_v6 = vmul.f32 %v214_v63, %v214_v63  ;;  %v230_v20 = vsub.f32 %v393_v34, %v214_v63 }
 0x18b   :  { %v218_v55 = vpop.xlane.xlu1 %217 }
 0x18c   :  { %v221_v58 = vmul.f32 0.0078125, %v218_v55  ;;  %v242_v25 = vmul.f32 %v239_v40, %v230_v20 }
 0x18e   :  { %v225_v59 = vsub.f32 %v221_v58, %v223_v56 }
 0x18f   :  { %v164_v61 = vpop.xlane.xlu1 %163 }
 0x190   :  { %v243_v0 = vadd.f32 1e-05, %v225_v59  ;;  %v166_v1 = vmul.f32 0.0078125, %v164_v61 }
 0x192   :  { %302 = vrsqrt.f32 %v243_v0  ;;  %v170_v2 = vsub.f32 %v166_v1, %v168_v62 }
 0x193   :  { %v220_v4 = vpop.xlane.xlu1 %219 }
 0x194   :  { %v301_v5 = vpop.eup %300  ;;  %v188_v7 = vadd.f32 1e-05, %v170_v2  ;;  %v222_v8 = vmul.f32 0.0078125, %v220_v4 }
 0x195   :  { %v191_v9 = vmul.f32 %v301_v5, %v185_v3 }
 0x196   :  { %304 = vrsqrt.f32 %v188_v7  ;;  %v226_v10 = vsub.f32 %v222_v8, %v224_v6 }
 0x197   :  { %v205_v12 = vadd.f32 %v198_v41, %v191_v9  ;;  %v259_v28 = vpop.permute.xlu1 %258 }
 0x198   :  { %v244_v13 = vadd.f32 1e-05, %v226_v10 }
 0x199   :  { %207 = vst [vmem:[%s422_s5] sm:$0xff] %v205_v12 }
 0x19a   :  { %306 = vrsqrt.f32 %v244_v13 }
 0x19c   :  { %v303_v16 = vpop.eup %302 }
 0x19d   :  { %v247_v17 = vmul.f32 %v303_v16, %v241_v14 }
 0x19f   :  { %v261_v21 = vadd.f32 %v254_v18, %v247_v17 }
 0x1a0   :  { %v305_v22 = vpop.eup %304 }
 0x1a1   :  { %v192_v23 = vmul.f32 %v305_v22, %v186_v19  ;;  %263 = vst [vmem:[%s422_s5 + $0x8] sm:$0xff] %v261_v21 }
 0x1a3   :  { %v206_v24 = vadd.f32 %v203_v42, %v192_v23 }
 0x1a4   :  { %v307_v26 = vpop.eup %306 }
 0x1a5   :  { %208 = vst [vmem:[%s422_s5 + $0x10] sm:$0xff] %v206_v24  ;;  %v248_v27 = vmul.f32 %v307_v26, %v242_v25 }
 0x1a7   :  { %v262_v29 = vadd.f32 %v259_v28, %v248_v27 }
 0x1a9   :  { %264 = vst [vmem:[%s422_s5 + $0x18] sm:$0xff] %v262_v29 }

// kernel: cross_and_learn_forward.9
= control target key start
LH: loop header
LB: loop body
LE: loop exit
PB: predicated region body
PF: predicated region fallthrough
CT: control target
= control target key end

     0   :  { %vm19_vm0 = vcmask 257024   ;;  %v280_v18 = vmov 0.0   ;;  %s361_s1 = inlined_call_operand.vmem [shape: bf16[256,32], index: 1, kind: input, shape index: {}]   ;;  %s362_s0 = inlined_call_operand.vmem [shape: bf16[4,256], index: 0, kind: input, shape index: {}]   ;;  %s363_s2 = inlined_call_operand.vmem [shape: f32[1,32], index: 2, kind: input, shape index: {}]   ;;  %s364_s3 = inlined_call_operand.vmem [shape: f32[4,32], index: 3, kind: output, shape index: {}]  }
   0x1   :  { %v264_v0 = vld [vmem:[%s361_s1 + $0x40] sm:$0xff]   ;;  %v266_v2 = vld [vmem:[%s361_s1 + $0x48] sm:$0xff]   ;;  %v268_v4 = vld [vmem:[%s361_s1 + $0x50] sm:$0xff]   ;;  %20 = vst.msk [vmem:[#allocation2] sm:$0xf] %vm19_vm0, %v280_v18 }
   0x2   :  { %v265_v1 = vld [vmem:[%s361_s1] sm:$0xff]   ;;  %241 = vmatprep.subr.bf16.mxu0 %v264_v0  ;;  %v267_v3 = vld [vmem:[%s361_s1 + $0x8] sm:$0xff]   ;;  %v269_v5 = vld [vmem:[%s361_s1 + $0x10] sm:$0xff]  }
   0x3   :  { %242 = vmatpush3.bf16.msra.mxu0 %v265_v1  ;;  %v270_v6 = vld [vmem:[%s361_s1 + $0x58] sm:$0xff]   ;;  %v272_v8 = vld [vmem:[%s361_s1 + $0x60] sm:$0xff]   ;;  %v274_v10 = vld [vmem:[%s361_s1 + $0x68] sm:$0xff]  }
   0x4   :  { %243 = vmatprep.subr.bf16.mxu0 %v266_v2  ;;  %v271_v7 = vld [vmem:[%s361_s1 + $0x18] sm:$0xff]   ;;  %v273_v9 = vld [vmem:[%s361_s1 + $0x20] sm:$0xff]   ;;  %v275_v13 = vld [vmem:[%s361_s1 + $0x28] sm:$0xff]  }
   0x5   :  { %v223_v11 = vld.sshfl [vmem:[%s362_s0] sm:$0x33 pattern:$0x76325410]  ;;  %v276_v14 = vld [vmem:[%s361_s1 + $0x70] sm:$0xff]   ;;  %v278_v16 = vld [vmem:[%s361_s1 + $0x78] sm:$0xff]  }
   0x6   :  { %v63_v12 = vcombine.high %v223_v11, %v223_v11  ;;  %v277_v15 = vld [vmem:[%s361_s1 + $0x30] sm:$0xff]   ;;  %v279_v17 = vld [vmem:[%s361_s1 + $0x38] sm:$0xff]   ;;  %v240_v26 = vld [vmem:[%s363_s2] ss:$0 sm:$0xff] }
   0x7   :  { %244 = vmatpush3.bf16.msra.mxu0 %v267_v3 }
   0x8   :  { %245 = vmatprep.subr.bf16.mxu0 %v268_v4  ;;  %194 = vmatprep.mubr.bf16.mxu0 %v63_v12  ;;  %v21_v20 = vld [vmem:[#allocation2] sm:$0xf] }
   0xb   :  { %246 = vmatpush3.bf16.msra.mxu0 %v269_v5 }
   0xc   :  { %247 = vmatprep.subr.bf16.mxu0 %v270_v6 }
   0xf   :  { %248 = vmatpush3.bf16.msra.mxu0 %v271_v7 }
  0x10   :  { %249 = vmatprep.subr.bf16.mxu0 %v272_v8 }
  0x13   :  { %250 = vmatpush3.bf16.msra.mxu0 %v273_v9 }
  0x14   :  { %251 = vmatprep.subr.bf16.mxu0 %v274_v10 }
  0x17   :  { %252 = vmatpush3.bf16.msra.mxu0 %v275_v13 }
  0x18   :  { %253 = vmatprep.subr.bf16.mxu0 %v276_v14 }
  0x1b   :  { %254 = vmatpush3.bf16.msra.mxu0 %v277_v15 }
  0x1c   :  { %255 = vmatprep.subr.bf16.mxu0 %v278_v16 }
  0x1f   :  { %256 = vmatpush3.bf16.msra.mxu0 %v279_v17 }
  0x22   :  { %195 = vmatmul.mubr.bf16.vlgmr.msra.gmra.mrb[0].mxu0 %v223_v11 }
  0xf5   :  { %v257_v19 = vpop.f32.mrb[0].mxu0 }
  0xf6   :  { %v258_v21 = vpop.f32.mrb[1].mxu0 }
  0xf7   :  { %v259_v22 = vadd.f32 %v258_v21, %v257_v19  ;;  %v260_v23 = vpop.f32.mrb[2].mxu0 }
  0xf8   :  { %v261_v24 = vpop.f32.mrb[3].mxu0 }
  0xf9   :  { %v202_v25 = vadd.f32 %v259_v22, %v21_v20 }
  0xfb   :  { %204 = vst.msk [vmem:[#allocation2] sm:$0xf] %vm19_vm0, %v202_v25 }
 0x102   :  { %v208_v27 = vld [vmem:[#allocation2] sm:$0xf] }
 0x103   :  { %v216_v28 = vadd.f32 %v240_v26, %v208_v27 }
 0x105   :  { %v217_v29 = vmax.f32 %v216_v28, 0.0 }
 0x107   :  { %218 = vst.msk [vmem:[%s364_s3] sm:$0xf] %vm19_vm0, %v217_v29 }

// kernel: cross_and_learn_forward.10
= control target key start
LH: loop header
LB: loop body
LE: loop exit
PB: predicated region body
PF: predicated region fallthrough
CT: control target
= control target key end

     0   :  { %v505_v3 = vmov 0   ;;  %vm152_vm0 = vcmask 1041408   ;;  %vm148_vm1 = vcmask 293888   ;;  %s698_s1 = inlined_call_operand.vmem [shape: bf16[36,1024], index: 1, kind: input, shape index: {}]   ;;  %s699_s2 = inlined_call_operand.vmem [shape: f32[8,1], index: 2, kind: input, shape index: {}]   ;;  %s700_s3 = inlined_call_operand.vmem [shape: f32[8,1], index: 3, kind: input, shape index: {}]   ;;  %s701_s0 = inlined_call_operand.vmem [shape: bf16[8,36], index: 0, kind: input, shape index: {}]   ;;  %s702_s4 = inlined_call_operand.vmem [shape: f32[8,1], index: 4, kind: input, shape index: {}]   ;;  %s703_s5 = inlined_call_operand.vmem [shape: f32[8,1024], index: 5, kind: output, shape index: {}]  }
   0x1   :  { %v22_v0 = vld [vmem:[%s698_s1] sm:$0xff]  ;;  %v23_v2 = vld [vmem:[%s698_s1 + $0x8] sm:$0xff]  ;;  %209 = vmatprep.mubr.bf16.mxu0 %v505_v3  ;;  %250 = vmatprep.mubr.bf16.mxu1 %v505_v3  ;;  %v24_v23 = vld [vmem:[%s698_s1 + $0x10] sm:$0xff] }
   0x2   :  { %v26_v1 = vld [vmem:[%s698_s1 + $0x20] sm:$0xff]  ;;  %v27_v5 = vld [vmem:[%s698_s1 + $0x28] sm:$0xff]  ;;  %491 = vset.pattern.permute.xlu0 %v505_v3  ;;  %492 = vset.pattern.permute.xlu1 %v505_v3  ;;  %v28_v24 = vld [vmem:[%s698_s1 + $0x30] sm:$0xff] }
   0x3   :  { %v459_v4 = vcombine.high %v22_v0, %v26_v1  ;;  %v458_v6 = vcombine.low %v22_v0, %v26_v1  ;;  %v30_v7 = vld [vmem:[%s698_s1 + $0x40] sm:$0xff]  ;;  %v461_v9 = vcombine.high %v23_v2, %v27_v5  ;;  %v460_v10 = vcombine.low %v23_v2, %v27_v5  ;;  %v31_v12 = vld [vmem:[%s698_s1 + $0x48] sm:$0xff]  ;;  %v25_v25 = vld [vmem:[%s698_s1 + $0x18] sm:$0xff] }
   0x4   :  { %v34_v8 = vld [vmem:[%s698_s1 + $0x60] sm:$0xff]  ;;  %v35_v13 = vld [vmem:[%s698_s1 + $0x68] sm:$0xff]  ;;  %v29_v26 = vld [vmem:[%s698_s1 + $0x38] sm:$0xff]  ;;  %v463_v30 = vcombine.high %v24_v23, %v28_v24  ;;  %v462_v38 = vcombine.low %v24_v23, %v28_v24 }
   0x5   :  { %v467_v11 = vcombine.high %v30_v7, %v34_v8  ;;  %v38_v14 = vld [vmem:[%s698_s1 + $0x80] sm:$0x33]  ;;  %177 = vmatprep.subr.bf16.mxu0 %v459_v4  ;;  %v469_v15 = vcombine.high %v31_v12, %v35_v13  ;;  %v39_v16 = vld [vmem:[%s698_s1 + $0x88] sm:$0x33]  ;;  %218 = vmatprep.subr.bf16.mxu1 %v461_v9  ;;  %v466_v17 = vcombine.low %v30_v7, %v34_v8  ;;  %v32_v33 = vld [vmem:[%s698_s1 + $0x50] sm:$0xff] }
   0x6   :  { %178 = vmatpush1.bf16.msra.mxu0 %v458_v6  ;;  %219 = vmatpush1.bf16.msra.mxu1 %v460_v10  ;;  %v468_v18 = vcombine.low %v31_v12, %v35_v13  ;;  %v475_v19 = vcombine.high %v38_v14, %v38_v14  ;;  %v474_v20 = vcombine.low %v38_v14, %v38_v14  ;;  %v42_v27 = vld [vmem:[%s699_s2] sm:$0xff]  ;;  %v36_v34 = vld [vmem:[%s698_s1 + $0x70] sm:$0xff]  ;;  %v33_v35 = vld [vmem:[%s698_s1 + $0x58] sm:$0xff] }
   0x7   :  { %179 = vmatprep.subr.bf16.mxu0 %v467_v11  ;;  %220 = vmatprep.subr.bf16.mxu1 %v469_v15  ;;  %v477_v21 = vcombine.high %v39_v16, %v39_v16  ;;  %v476_v22 = vcombine.low %v39_v16, %v39_v16  ;;  %v368_v28 = vld [vmem:[%s700_s3] sm:$0xff]  ;;  %v465_v32 = vcombine.high %v25_v25, %v29_v26  ;;  %v37_v36 = vld [vmem:[%s698_s1 + $0x78] sm:$0xff]  ;;  %v40_v42 = vld [vmem:[%s698_s1 + $0x90] sm:$0x33] }
   0x8   :  { %45 = vperm.xlu0 %491, %v42_v27   ;;  %v154_v29 = vsel %vm152_vm0, %v474_v20, 0  ;;  %375 = vperm.xlu1 %492, %v368_v28   ;;  %v21_v37 = vld [vmem:[%s701_s0] sm:$0xf]  ;;  %v464_v39 = vcombine.low %v25_v25, %v29_v26  ;;  %v471_v40 = vcombine.high %v32_v33, %v36_v34  ;;  %v473_v41 = vcombine.high %v33_v35, %v37_v36  ;;  %v41_v43 = vld [vmem:[%s698_s1 + $0x98] sm:$0x33] }
   0x9   :  { %v160_v31 = vsel %vm152_vm0, %v476_v22, 0  ;;  %v470_v44 = vcombine.low %v32_v33, %v36_v34  ;;  %v472_v45 = vcombine.low %v33_v35, %v37_v36  ;;  %v479_v46 = vcombine.high %v40_v42, %v40_v42 }
   0xa   :  { %180 = vmatpush1.bf16.msra.mxu0 %v466_v17  ;;  %221 = vmatpush1.bf16.msra.mxu1 %v468_v18  ;;  %v478_v47 = vcombine.low %v40_v42, %v40_v42  ;;  %v481_v48 = vcombine.high %v41_v43, %v41_v43  ;;  %v480_v49 = vcombine.low %v41_v43, %v41_v43 }
   0xb   :  { %482 = vmatprep.subr.msk.bf16.mxu0 %vm152_vm0, %v475_v19  ;;  %484 = vmatprep.subr.msk.bf16.mxu1 %vm152_vm0, %v477_v21 }
   0xc   :  { %427 = vperm.xlu1 %492, %v368_v28   ;;  %v166_v50 = vsel %vm152_vm0, %v478_v47, 0  ;;  %v172_v51 = vsel %vm152_vm0, %v480_v49, 0 }
   0xe   :  { %182 = vmatpush1.bf16.msra.mxu0 %v154_v29  ;;  %223 = vmatpush1.bf16.msra.mxu1 %v160_v31 }
   0xf   :  { %259 = vmatprep.subr.bf16.mxu0 %v463_v30  ;;  %300 = vmatprep.subr.bf16.mxu1 %v465_v32 }
  0x11   :  { %483 = vmatmul.mubr.msk.bf16.vlgmr.msra.gmra.mrb[0].mxu0 %vm148_vm1, %v21_v37  ;;  %485 = vmatmul.mubr.msk.bf16.vlgmr.msra.gmra.mrb[0].mxu1 %vm148_vm1, %v21_v37 }
  0x12   :  { %260 = vmatpush1.bf16.msra.mxu0 %v462_v38  ;;  %301 = vmatpush1.bf16.msra.mxu1 %v464_v39 }
  0x13   :  { %261 = vmatprep.subr.bf16.mxu0 %v471_v40  ;;  %302 = vmatprep.subr.bf16.mxu1 %v473_v41  ;;  %v440_v41 = vld [vmem:[%s702_s4] sm:$0xff] }
  0x14   :  { %291 = vmatprep.mubr.bf16.mxu0 %v505_v3  ;;  %332 = vmatprep.mubr.bf16.mxu1 %v505_v3 }
  0x16   :  { %262 = vmatpush1.bf16.msra.mxu0 %v470_v44  ;;  %303 = vmatpush1.bf16.msra.mxu1 %v472_v45 }
  0x17   :  { %486 = vmatprep.subr.msk.bf16.mxu0 %vm152_vm0, %v479_v46  ;;  %488 = vmatprep.subr.msk.bf16.mxu1 %vm152_vm0, %v481_v48 }
  0x1a   :  { %264 = vmatpush1.bf16.msra.mxu0 %v166_v50  ;;  %305 = vmatpush1.bf16.msra.mxu1 %v172_v51 }
  0x1d   :  { %487 = vmatmul.mubr.msk.bf16.vlgmr.msra.gmra.mrb[4].mxu0 %vm148_vm1, %v21_v37  ;;  %489 = vmatmul.mubr.msk.bf16.vlgmr.msra.gmra.mrb[4].mxu1 %vm148_vm1, %v21_v37 }
  0x87   :  { %v46_v52 = vpop.permute.xlu0 %45  ;;  %v376_v42 = vpop.permute.xlu1 %375 }
  0x8b   :  { %v428_v43 = vpop.permute.xlu1 %427 }
  0xe4   :  { %v211_v53 = vpop.f32.mrb[0].mxu0  ;;  %v252_v55 = vpop.f32.mrb[0].mxu1 }
  0xe5   :  { %v213_v54 = vpop.f32.mrb[1].mxu0  ;;  %v212_v56 = vadd.f32 %v211_v53, %v46_v52  ;;  %v253_v58 = vadd.f32 %v252_v55, %v46_v52  ;;  %v254_v60 = vpop.f32.mrb[1].mxu1 }
  0xe6   :  { %v214_v57 = vadd.f32 %v213_v54, %v46_v52  ;;  %v215_v59 = vpop.f32.mrb[2].mxu0  ;;  %v255_v61 = vadd.f32 %v254_v60, %v46_v52  ;;  %v256_v63 = vpop.f32.mrb[2].mxu1 }
  0xe7   :  { %v216_v62 = vpop.f32.mrb[3].mxu0  ;;  %v623_v0 = vmax.f32 %v212_v56, 0.0  ;;  %v627_v2 = vmax.f32 %v253_v58, 0.0  ;;  %v257_v3 = vpop.f32.mrb[3].mxu1 }
  0xe8   :  { %v625_v1 = vmax.f32 %v214_v57, 0.0  ;;  %v629_v4 = vmax.f32 %v255_v61, 0.0 }
  0xe9   :  { %v356_v5 = vmul.f32 %v623_v0, %v623_v0  ;;  %v358_v8 = vmul.f32 %v627_v2, %v627_v2 }
  0xea   :  { %v357_v6 = vmul.f32 %v625_v1, %v625_v1  ;;  %v349_v7 = vadd.f32 %v625_v1, %v623_v0  ;;  %v359_v10 = vmul.f32 %v629_v4, %v629_v4 }
  0xec   :  { %v350_v9 = vadd.f32 %v349_v7, %v627_v2  ;;  %v360_v11 = vadd.f32 %v357_v6, %v356_v5 }
  0xee   :  { %v351_v12 = vadd.f32 %v350_v9, %v629_v4  ;;  %v361_v13 = vadd.f32 %v360_v11, %v358_v8 }
  0xf0   :  { %v293_v14 = vpop.f32.mrb[4].mxu0  ;;  %352 = vadd.xlane.f32.xlu0 %v351_v12  ;;  %v362_v15 = vadd.f32 %v361_v13, %v359_v10  ;;  %v334_v17 = vpop.f32.mrb[4].mxu1 }
  0xf1   :  { %v294_v16 = vadd.f32 %v293_v14, %v46_v52  ;;  %v295_v18 = vpop.f32.mrb[5].mxu0  ;;  %v335_v19 = vadd.f32 %v334_v17, %v46_v52  ;;  %v336_v21 = vpop.f32.mrb[5].mxu1 }
  0xf2   :  { %v296_v20 = vadd.f32 %v295_v18, %v46_v52  ;;  %v297_v22 = vpop.f32.mrb[6].mxu0  ;;  %363 = vadd.xlane.f32.xlu1 %v362_v15  ;;  %v338_v24 = vpop.f32.mrb[6].mxu1  ;;  %v337_v28 = vadd.f32 %v336_v21, %v46_v52 }
  0xf3   :  { %v643_v23 = vmax.f32 %v294_v16, 0.0  ;;  %v298_v25 = vpop.f32.mrb[7].mxu0  ;;  %v645_v26 = vmax.f32 %v335_v19, 0.0  ;;  %v339_v29 = vpop.f32.mrb[7].mxu1 }
  0xf4   :  { %v647_v27 = vmax.f32 %v296_v20, 0.0  ;;  %v655_v33 = vmax.f32 %v337_v28, 0.0 }
  0xf5   :  { %v408_v30 = vmul.f32 %v643_v23, %v643_v23  ;;  %v410_v35 = vmul.f32 %v645_v26, %v645_v26 }
  0xf6   :  { %v409_v31 = vmul.f32 %v647_v27, %v647_v27  ;;  %v402_v32 = vadd.f32 %v647_v27, %v643_v23  ;;  %v411_v39 = vmul.f32 %v655_v33, %v655_v33 }
  0xf8   :  { %v403_v34 = vadd.f32 %v402_v32, %v645_v26  ;;  %v412_v36 = vadd.f32 %v409_v31, %v408_v30 }
  0xfa   :  { %v404_v37 = vadd.f32 %v403_v34, %v655_v33  ;;  %v413_v38 = vadd.f32 %v412_v36, %v410_v35 }
  0xfc   :  { %405 = vadd.xlane.f32.xlu1 %v404_v37  ;;  %v414_v40 = vadd.f32 %v413_v38, %v411_v39 }
 0x100   :  { %415 = vadd.xlane.f32.xlu1 %v414_v40 }
 0x106   :  { %443 = vperm.xlu0 %491, %v440_v41  }
 0x111   :  { %391 = vperm.xlu1 %492, %v440_v41  }
 0x17d   :  { %v353_v44 = vpop.xlane.xlu0 %352 }
 0x17e   :  { %v355_v45 = vmul.f32 0.001953125, %v353_v44 }
 0x17f   :  { %v364_v46 = vpop.xlane.xlu1 %363 }
 0x180   :  { %v365_v47 = vmul.f32 0.001953125, %v364_v46  ;;  %v366_v48 = vmul.f32 %v355_v45, %v355_v45  ;;  %v369_v52 = vsub.f32 %v623_v0, %v355_v45  ;;  %v370_v54 = vsub.f32 %v625_v1, %v355_v45 }
 0x181   :  { %v371_v55 = vsub.f32 %v627_v2, %v355_v45  ;;  %v372_v56 = vsub.f32 %v629_v4, %v355_v45 }
 0x182   :  { %v367_v49 = vsub.f32 %v365_v47, %v366_v48  ;;  %v378_v58 = vmul.f32 %v376_v42, %v369_v52  ;;  %v379_v61 = vmul.f32 %v376_v42, %v370_v54 }
 0x183   :  { %v380_v62 = vmul.f32 %v376_v42, %v371_v55  ;;  %v381_v3 = vmul.f32 %v376_v42, %v372_v56 }
 0x184   :  { %v382_v50 = vadd.f32 1e-05, %v367_v49 }
 0x185   :  { %v444_v28 = vpop.permute.xlu0 %443 }
 0x186   :  { %501 = vrsqrt.f32 %v382_v50 }
 0x189   :  { %v406_v51 = vpop.xlane.xlu1 %405 }
 0x18a   :  { %v407_v53 = vmul.f32 0.001953125, %v406_v51 }
 0x18c   :  { %v418_v59 = vmul.f32 %v407_v53, %v407_v53  ;;  %v421_v4 = vsub.f32 %v643_v23, %v407_v53  ;;  %v422_v13 = vsub.f32 %v647_v27, %v407_v53  ;;  %v423_v14 = vsub.f32 %v645_v26, %v407_v53 }
 0x18d   :  { %v416_v57 = vpop.xlane.xlu1 %415  ;;  %v424_v15 = vsub.f32 %v655_v33, %v407_v53 }
 0x18e   :  { %v417_v60 = vmul.f32 0.001953125, %v416_v57  ;;  %v430_v16 = vmul.f32 %v428_v43, %v421_v4  ;;  %v431_v17 = vmul.f32 %v428_v43, %v422_v13  ;;  %v432_v18 = vmul.f32 %v428_v43, %v423_v14 }
 0x18f   :  { %v433_v19 = vmul.f32 %v428_v43, %v424_v15 }
 0x190   :  { %v502_v63 = vpop.eup %501  ;;  %v419_v5 = vsub.f32 %v417_v60, %v418_v59 }
 0x191   :  { %v392_v6 = vpop.permute.xlu1 %391  ;;  %v384_v7 = vmul.f32 %v502_v63, %v378_v58  ;;  %v385_v8 = vmul.f32 %v502_v63, %v379_v61  ;;  %v386_v0 = vmul.f32 %v502_v63, %v380_v62  ;;  %v387_v9 = vmul.f32 %v502_v63, %v381_v3 }
 0x192   :  { %v434_v10 = vadd.f32 1e-05, %v419_v5 }
 0x193   :  { %v394_v1 = vadd.f32 %v392_v6, %v384_v7  ;;  %v395_v11 = vadd.f32 %v392_v6, %v385_v8  ;;  %v396_v2 = vadd.f32 %v392_v6, %v386_v0  ;;  %v397_v12 = vadd.f32 %v392_v6, %v387_v9 }
 0x194   :  { %503 = vrsqrt.f32 %v434_v10 }
 0x195   :  { %398 = vst [vmem:[%s703_s5] sm:$0xff] %v394_v1  ;;  %399 = vst [vmem:[%s703_s5 + $0x8] sm:$0xff] %v395_v11 }
 0x196   :  { %400 = vst [vmem:[%s703_s5 + $0x10] sm:$0xff] %v396_v2  ;;  %401 = vst [vmem:[%s703_s5 + $0x18] sm:$0xff] %v397_v12 }
 0x19e   :  { %v504_v20 = vpop.eup %503 }
 0x19f   :  { %v436_v21 = vmul.f32 %v504_v20, %v430_v16  ;;  %v437_v22 = vmul.f32 %v504_v20, %v431_v17  ;;  %v438_v24 = vmul.f32 %v504_v20, %v432_v18  ;;  %v439_v25 = vmul.f32 %v504_v20, %v433_v19 }
 0x1a1   :  { %v446_v29 = vadd.f32 %v444_v28, %v436_v21  ;;  %v447_v30 = vadd.f32 %v444_v28, %v437_v22  ;;  %v448_v31 = vadd.f32 %v444_v28, %v438_v24  ;;  %v449_v23 = vadd.f32 %v444_v28, %v439_v25 }
 0x1a3   :  { %450 = vst [vmem:[%s703_s5 + $0x20] sm:$0xff] %v446_v29  ;;  %451 = vst [vmem:[%s703_s5 + $0x28] sm:$0xff] %v447_v30 }
 0x1a4   :  { %452 = vst [vmem:[%s703_s5 + $0x30] sm:$0xff] %v448_v31  ;;  %453 = vst [vmem:[%s703_s5 + $0x38] sm:$0xff] %v449_v23 }

// kernel: cross_and_learn_forward.13
= control target key start
LH: loop header
LB: loop body
LE: loop exit
PB: predicated region body
PF: predicated region fallthrough
CT: control target
= control target key end

     0   :  { %vm25_vm0 = vcmask 254976   ;;  %v224_v4 = vmov 0   ;;  %s295_s0 = inlined_call_operand.vmem [shape: f32[2,32], index: 0, kind: input, shape index: {}]   ;;  %s296_s1 = inlined_call_operand.vmem [shape: f32[2,32], index: 1, kind: input, shape index: {}]   ;;  %s297_s2 = inlined_call_operand.vmem [shape: f32[2,32], index: 2, kind: input, shape index: {}]   ;;  %s298_s3 = inlined_call_operand.vmem [shape: f32[2,32], index: 3, kind: input, shape index: {}]   ;;  %s299_s4 = inlined_call_operand.vmem [shape: f32[2,4], index: 4, kind: output, shape index: {0}]   ;;  %s300_s5 = inlined_call_operand.hbm [shape: s32[4], index: 5, kind: output, shape index: {1}]  }
   0x1   :  { %v22_v0 = vld [vmem:[%s297_s2] sm:$0x3] }
   0x2   :  { %v20_v1 = vld [vmem:[%s295_s0] sm:$0x3]  ;;  %vm129_vm1 = vcmp.ne.f32.partialorder %v22_v0, 0.0 }
   0x3   :  { %vm81_vm2 = vcmp.ne.f32.partialorder %v20_v1, 0.0  ;;  %v23_v2 = vld [vmem:[%s298_s3] sm:$0x3]  ;;  %v130_v5 = vsel %vm129_vm1, 1, %v224_v4 }
   0x4   :  { %v21_v3 = vld [vmem:[%s296_s1] sm:$0x3]  ;;  %v82_v6 = vsel %vm81_vm2, 1, %v224_v4  ;;  %vm153_vm3 = vcmp.ne.f32.partialorder %v23_v2, 0.0 }
   0x5   :  { %vm105_vm4 = vcmp.ne.f32.partialorder %v21_v3, 0.0 }
   0x6   :  { %11 = vsyncpa [#allocation3], 0  ;;  %v131_v7 = vsel %vm25_vm0, %v130_v5, 0  ;;  %v83_v8 = vsel %vm25_vm0, %v82_v6, 0  ;;  %v154_v9 = vsel %vm153_vm3, 1, %v224_v4  ;;  %v106_v10 = vsel %vm105_vm4, 1, %v224_v4 }
   0x7   :  { %v133_v11 = vshrl.u32 %v131_v7, 16  ;;  %v85_v12 = vshrl.u32 %v83_v8, 16  ;;  %v155_v13 = vsel %vm25_vm0, %v154_v9, 0  ;;  %v107_v14 = vsel %vm25_vm0, %v106_v10, 0  ;;  %s212_s30 = scalar_lea.hbm %s300_s5, 16 }
   0x8   :  { %v157_v15 = vshrl.u32 %v155_v13, 16  ;;  %v109_v16 = vshrl.u32 %v107_v14, 16  ;;  %v108_v21 = vand.u32 65535, %v107_v14  ;;  %v84_v22 = vand.u32 65535, %v83_v8  ;;  %p213_p0 = scmp.ne.s32.totalorder %s300_s5, %s212_s30  ;;  %p216_p1 = scmp.lt.u32.totalorder %s212_s30, %s300_s5 }
   0x9   :  { %v135_v17 = vcvt.s32.f32 %v133_v11  ;;  %v87_v18 = vcvt.s32.f32 %v85_v12  ;;  %v156_v25 = vand.u32 65535, %v155_v13  ;;  %v132_v26 = vand.u32 65535, %v131_v7 }
   0xa   :  { %v159_v19 = vcvt.s32.f32 %v157_v15  ;;  %v111_v20 = vcvt.s32.f32 %v109_v16  ;;  %v110_v23 = vcvt.s32.f32 %v108_v21  ;;  %v86_v24 = vcvt.s32.f32 %v84_v22  ;;  %p218_p2 = pnand %p216_p1, %p213_p0 }
   0xb   :  { %138 = vadd.xlane.f32.xlu1 %v135_v17  ;;  %90 = vadd.xlane.f32.xlu0 %v87_v18  ;;  %v158_v27 = vcvt.s32.f32 %v156_v25  ;;  %v134_v28 = vcvt.s32.f32 %v132_v26  ;;  %v34_v29 = vmul.f32 %v21_v3, %v21_v3  ;;  %v29_v30 = vmul.f32 %v20_v1, %v20_v1 }
   0xc   :  { %v51_v33 = vmul.f32 %v23_v2, %v23_v2  ;;  %v46_v34 = vmul.f32 %v22_v0, %v22_v0  ;;  %v24_v37 = vmul.f32 %v21_v3, %v20_v1  ;;  %v42_v38 = vmul.f32 %v23_v2, %v22_v0 }
   0xd   :  { %v35_v31 = vsel %vm25_vm0, %v34_v29, 0.0  ;;  %v30_v32 = vsel %vm25_vm0, %v29_v30, 0.0  ;;  %v59_v41 = vmul.f32 %v22_v0, %v20_v1  ;;  %v66_v42 = vmul.f32 %v23_v2, %v21_v3 }
   0xe   :  { %v52_v35 = vsel %vm25_vm0, %v51_v33, 0.0  ;;  %v47_v36 = vsel %vm25_vm0, %v46_v34, 0.0  ;;  %v26_v39 = vsel %vm25_vm0, %v24_v37, 0.0  ;;  %v43_v40 = vsel %vm25_vm0, %v42_v38, 0.0 }
   0xf   :  { %162 = vadd.xlane.f32.xlu1 %v159_v19  ;;  %114 = vadd.xlane.f32.xlu0 %v111_v20  ;;  %v60_v43 = vsel %vm25_vm0, %v59_v41, 0.0  ;;  %v67_v44 = vsel %vm25_vm0, %v66_v42, 0.0  ;;  %vm73_vm5 = vcmask 7168   ;;  %vm75_vm6 = vcmask 15360  }
  0x10   :  { %vm77_vm7 = vcmask 23552   ;;  %vm79_vm8 = vcmask 25600  }
  0x13   :  { %112 = vadd.xlane.f32.xlu1 %v110_v23  ;;  %88 = vadd.xlane.f32.xlu0 %v86_v24 }
  0x17   :  { %160 = vadd.xlane.f32.xlu1 %v158_v27  ;;  %136 = vadd.xlane.f32.xlu0 %v134_v28 }
  0x1b   :  { %36 = vadd.xlane.f32.xlu1 %v35_v31  ;;  %31 = vadd.xlane.f32.xlu0 %v30_v32 }
  0x1f   :  { %53 = vadd.xlane.f32.xlu1 %v52_v35  ;;  %48 = vadd.xlane.f32.xlu0 %v47_v36 }
  0x23   :  { %27 = vadd.xlane.f32.xlu0 %v26_v39  ;;  %44 = vadd.xlane.f32.xlu1 %v43_v40 }
  0x27   :  { %61 = vadd.xlane.f32.xlu0 %v60_v43  ;;  %68 = vadd.xlane.f32.xlu1 %v67_v44 }
  0x98   :  { %v139_v45 = vpop.xlane.xlu1 %138  ;;  %v91_v46 = vpop.xlane.xlu0 %90 }
  0x99   :  { %v93_v49 = vcvt.f32.s32 %v91_v46  ;;  %v141_v51 = vcvt.f32.s32 %v139_v45 }
  0x9b   :  { %v94_v55 = vshll.u32 %v93_v49, 16  ;;  %v142_v61 = vshll.u32 %v141_v51, 16 }
  0x9c   :  { %v163_v47 = vpop.xlane.xlu1 %162  ;;  %v115_v48 = vpop.xlane.xlu0 %114 }
  0x9d   :  { %v117_v50 = vcvt.f32.s32 %v115_v48  ;;  %v165_v52 = vcvt.f32.s32 %v163_v47 }
  0x9f   :  { %v118_v56 = vshll.u32 %v117_v50, 16  ;;  %v166_v62 = vshll.u32 %v165_v52, 16 }
  0xa0   :  { %v113_v53 = vpop.xlane.xlu1 %112  ;;  %v89_v54 = vpop.xlane.xlu0 %88 }
  0xa1   :  { %v116_v57 = vcvt.f32.s32 %v113_v53  ;;  %v92_v58 = vcvt.f32.s32 %v89_v54 }
  0xa3   :  { %v119_v59 = vadd.s32 %v118_v56, %v116_v57  ;;  %v95_v60 = vadd.s32 %v94_v55, %v92_v58 }
  0xa4   :  { %v161_v63 = vpop.xlane.xlu1 %160  ;;  %v137_v0 = vpop.xlane.xlu0 %136 }
  0xa5   :  { %v120_v1 = vrot.slane %v119_v59, 4  ;;  %v96_v2 = vrot.slane %v95_v60, 4  ;;  %v164_v3 = vcvt.f32.s32 %v161_v63  ;;  %v140_v4 = vcvt.f32.s32 %v137_v0 }
  0xa7   :  { %v121_v5 = vadd.s32 %v120_v1, %v119_v59  ;;  %v167_v6 = vadd.s32 %v166_v62, %v164_v3  ;;  %v143_v7 = vadd.s32 %v142_v61, %v140_v4  ;;  %v97_v8 = vadd.s32 %v96_v2, %v95_v60 }
  0xa8   :  { %v37_v9 = vpop.xlane.xlu1 %36  ;;  %v32_v10 = vpop.xlane.xlu0 %31 }
  0xa9   :  { %v168_v11 = vrot.slane %v167_v6, 4  ;;  %v144_v12 = vrot.slane %v143_v7, 4  ;;  %v98_v13 = vrot.slane %v97_v8, 2  ;;  %v122_v14 = vrot.slane %v121_v5, 2 }
  0xaa   :  { %v38_v15 = vadd.f32 0.001, %v37_v9  ;;  %v33_v16 = vadd.f32 0.001, %v32_v10 }
  0xab   :  { %v169_v17 = vadd.s32 %v168_v11, %v167_v6  ;;  %v145_v18 = vadd.s32 %v144_v12, %v143_v7  ;;  %v99_v19 = vadd.s32 %v98_v13, %v97_v8  ;;  %v123_v20 = vadd.s32 %v122_v14, %v121_v5 }
  0xac   :  { %v39_v21 = vmul.f32 %v38_v15, %v33_v16  ;;  %v54_v22 = vpop.xlane.xlu1 %53  ;;  %v49_v23 = vpop.xlane.xlu0 %48 }
  0xad   :  { %v100_v24 = vrot.slane %v99_v19, 1  ;;  %v124_v25 = vrot.slane %v123_v20, 1  ;;  %v146_v26 = vrot.slane %v145_v18, 2  ;;  %v170_v27 = vrot.slane %v169_v17, 2 }
  0xae   :  { %204 = vrsqrt.f32 %v39_v21  ;;  %v55_v28 = vadd.f32 0.001, %v54_v22  ;;  %v50_v29 = vadd.f32 0.001, %v49_v23 }
  0xaf   :  { %v101_v30 = vadd.s32 %v100_v24, %v99_v19  ;;  %v125_v31 = vadd.s32 %v124_v25, %v123_v20  ;;  %v147_v32 = vadd.s32 %v146_v26, %v145_v18  ;;  %v171_v33 = vadd.s32 %v170_v27, %v169_v17 }
  0xb0   :  { %v70_v34 = vmul.f32 %v55_v28, %v38_v15  ;;  %v56_v35 = vmul.f32 %v55_v28, %v50_v29  ;;  %v63_v36 = vmul.f32 %v50_v29, %v33_v16  ;;  %v45_v41 = vpop.xlane.xlu1 %44  ;;  %v28_v42 = vpop.xlane.xlu0 %27 }
  0xb1   :  { %194 = vpush %v101_v30  ;;  %v148_v37 = vrot.slane %v147_v32, 1  ;;  %v172_v38 = vrot.slane %v171_v33, 1 }
  0xb2   :  { %196 = vpush %v125_v31  ;;  %206 = vrsqrt.f32 %v70_v34 }
  0xb3   :  { %v149_v39 = vadd.s32 %v148_v37, %v147_v32  ;;  %v173_v40 = vadd.s32 %v172_v38, %v171_v33  ;;  %208 = vrsqrt.f32 %v56_v35 }
  0xb4   :  { %210 = vrsqrt.f32 %v63_v36  ;;  %v69_v44 = vpop.xlane.xlu1 %68  ;;  %v62_v47 = vpop.xlane.xlu0 %61 }
  0xb5   :  { %198 = vpush %v149_v39 }
  0xb6   :  { %200 = vpush %v173_v40 }
  0xb8   :  { %v205_v43 = vpop.eup %204 }
  0xb9   :  { %v41_v46 = vmul.f32 %v205_v43, %v28_v42 }
  0xbc   :  { %v207_v45 = vpop.eup %206 }
  0xbd   :  { %v209_v48 = vpop.eup %208  ;;  %v72_v51 = vmul.f32 %v207_v45, %v69_v44 }
  0xbe   :  { %v211_v49 = vpop.eup %210  ;;  %v58_v50 = vmul.f32 %v209_v48, %v45_v41 }
  0xbf   :  { %v65_v52 = vmul.f32 %v211_v49, %v62_v47 }
  0xc0   :  { %v74_v53 = vsel %vm73_vm5, %v41_v46, %v58_v50 }
  0xc1   :  { %v76_v54 = vsel %vm75_vm6, %v74_v53, %v65_v52 }
  0xc2   :  { %v78_v55 = vsel %vm77_vm7, %v76_v54, %v72_v51 }
  0xc3   :  { %80 = vst.msk [vmem:[%s299_s4] sm:$0x3] %vm79_vm8, %v78_v55 }
  0xe2   :  { %s195_s2 = spop %194 }
  0xe3   :  { %104 = sst [smem:[#allocation2]] %s195_s2  ;;  %s197_s3 = spop %196 }
  0xe4   :  { %128 = sst [smem:[#allocation2 + $0x1]] %s197_s3 }
  0xe6   :  { %s199_s26 = spop %198 }
  0xe7   :  { %152 = sst [smem:[#allocation2 + $0x2]] %s199_s26  ;;  %s201_s27 = spop %200 }
  0xe8   :  { %176 = sst [smem:[#allocation2 + $0x3]] %s201_s27 }
  0xe9   :  { %221 = shalt.err (!%p218_p2)
}
  0xea   :  { %s225_s4 = smov [#allocation2]  }
  0xeb   :  { %186 = dma.smem_to_hbm %s225_s4, 16, %s300_s5, [#allocation3]  }
  0xec   :  { %222 = dma.done.wait [#allocation3], 16  }
  0xed   :  { %223 = vsyncadd [#allocation3], 4294967280 }
  0xee   :  { %192 = sfence }
  0xef   :  { %193 = vsyncpa [#allocation3], 1 }

</bundles_post_ra>
